<compile_context>
chip_gen: v6e
topology: v6e:2x2x1
jax: 0.10.0
libtpu: 0.0.40
codegen_flags: <defaults>
</compile_context>

<pallas_src>
import functools

import jax
import jax.numpy as jnp
from jax.experimental import pallas as pl
from jax.experimental.pallas import tpu as pltpu

CLASS_SIZE = 7
BN_EPS = 1e-5
SUB = 8  # sublane granularity for the Cout dimension

# (kernel, stride, padding, activation, use_pallas, tm) -- static per layer.
LAYER_CFG = (
    (4, 1, 0, "relu", False, 0),      # conv1 + bn1  (tiny -> plain jnp)
    (3, 1, 0, "relu", False, 0),      # conv2 + bn2
    (4, 2, 1, "relu", False, 0),      # conv3 + bn3
    (4, 2, 1, "relu", False, 0),      # conv4 + bn4
    (4, 2, 0, "relu", True, 1280),    # conv5 + bn5  (M=B*50*50 -> 4 tiles @ B=2)
    (4, 2, 1, "tanh", True, 2560),    # conv6, no BN (M=B*100*100 -> 8 tiles @ B=2)
)


# ----------------------------------------------------------------------------
# Pallas kernel: fused (weight_bf16 @ patches_bf16) -> f32, + bias, activation.
# Output is (Cout padded to 8, tm) -- lane-dense along the pixel axis M.
# ----------------------------------------------------------------------------
def _wm_mm_bias_act_kernel(w_ref, x_ref, b_ref, o_ref, *, act):
    # w_ref: (Cp, K)  bf16  resident weight (BN scale folded, rows padded to 8)
    # x_ref: (K, tm)  bf16  streamed transposed-im2col patches
    # b_ref: (Cp, 1)  f32   per-channel bias (BN folded)
    # o_ref: (Cp, tm)       lane-dense output block
    y = jnp.dot(w_ref[...], x_ref[...], preferred_element_type=jnp.float32)
    y = y + b_ref[...]
    if act == "relu":
        y = jnp.maximum(y, 0.0)
    else:  # tanh
        y = jnp.tanh(y)
    o_ref[...] = y.astype(o_ref.dtype)


def matmul_bias_act_pallas(wm, patches, bias, act, tm, out_dtype):
    """(Cout, K) @ (K, M) with fused bias + activation -> (Cout, M).

    - bf16 operands, f32 MXU accumulate.
    - Cout padded only to 8 sublanes (not 128 lanes): redundant bias/act/store
      work is ~8/Cout instead of ~128/Cout.
    - M is not padded: grid = cdiv(M, tm); Pallas pads the ragged last input
      block with unspecified values and drops out-of-bounds output lanes
      (valid output columns depend only on valid input columns).
    """
    Cout, K = wm.shape
    _, M = patches.shape
    assert tm % 128 == 0
    Cp = ((Cout + SUB - 1) // SUB) * SUB

    wp = jnp.pad(wm.astype(jnp.bfloat16), ((0, Cp - Cout), (0, 0)))
    bp = jnp.pad(bias.astype(jnp.float32), (0, Cp - Cout))[:, None]
    xb = patches.astype(jnp.bfloat16)

    out = pl.pallas_call(
        functools.partial(_wm_mm_bias_act_kernel, act=act),
        out_shape=jax.ShapeDtypeStruct((Cp, M), out_dtype),
        grid_spec=pltpu.PrefetchScalarGridSpec(
            num_scalar_prefetch=0,
            grid=(pl.cdiv(M, tm),),
            in_specs=[
                pl.BlockSpec((Cp, K), lambda i: (0, 0)),   # resident weight
                pl.BlockSpec((K, tm), lambda i: (0, i)),   # streamed patches
                pl.BlockSpec((Cp, 1), lambda i: (0, 0)),   # resident bias
            ],
            out_specs=pl.BlockSpec((Cp, tm), lambda i: (0, i)),
        ),
        compiler_params=pltpu.CompilerParams(
            # Even tile counts (4 / 8) so v7x's two TensorCores split evenly.
            dimension_semantics=("parallel",),
            vmem_limit_bytes=32 * 1024 * 1024,   # safe on v5e/v6e/v7x
        ),
    )(wp, xb, bp)
    return out[:Cout, :]


# ----------------------------------------------------------------------------
# Plain-JAX glue: transposed conv -> zero-dilation + pad + transposed im2col.
# Activations use (C, B, H, W) layout so the (Cout, M) matmul result reshapes
# directly into the next layer's input.
# ----------------------------------------------------------------------------
def _dilate_hw(x, s):
    """Insert (s-1) zeros between spatial elements. x: (C, B, H, W)."""
    if s == 1:
        return x
    C, B, H, W = x.shape
    y = jnp.zeros((C, B, (H - 1) * s + 1, (W - 1) * s + 1), x.dtype)
    return y.at[:, :, ::s, ::s].set(x)


def _im2col_t(x, k):
    """x: (C, B, H, W) -> patches (k*k*C, B*Ho*Wo); row order (kh, kw, c)."""
    # TODO(synk): longer term, fuse im2col into the Pallas kernel via a (kh,kw)
    # reduction grid axis instead of concatenating k*k shifted copies in XLA.
    C, B, H, W = x.shape
    Ho, Wo = H - k + 1, W - k + 1
    rows = []
    for kh in range(k):
        for kw in range(k):
            rows.append(x[:, :, kh:kh + Ho, kw:kw + Wo].reshape(C, B * Ho * Wo))
    return jnp.concatenate(rows, axis=0), (B, Ho, Wo)


def conv_transpose_layer(x_cnhw, w, stride, padding, bn_scale, bn_bias, act,
                         use_pallas, tm, out_dtype):
    """ConvTranspose2d (PyTorch weight layout (Cin,Cout,kH,kW), bias=False)
    fused with eval-mode BatchNorm (scale folded into weight rows) + act."""
    Cin, Cout, k, _ = w.shape
    if use_pallas:
        x_cnhw = x_cnhw.astype(jnp.bfloat16)   # bf16 im2col glue (half the bytes)
    xd = _dilate_hw(x_cnhw, stride)
    pad = k - 1 - padding
    xp = jnp.pad(xd, ((0, 0), (0, 0), (pad, pad), (pad, pad)))
    patches, (B, Ho, Wo) = _im2col_t(xp, k)                      # (K, M)

    # Equivalent direct-conv weight as LHS: flip spatially -> (Cout, kh, kw, Cin).
    wf = w[:, :, ::-1, ::-1]
    wm = jnp.transpose(wf, (1, 2, 3, 0)).reshape(Cout, k * k * Cin)
    wm = wm * bn_scale[:, None]                # fold BN scale into weight rows

    if use_pallas:
        out = matmul_bias_act_pallas(patches=patches, wm=wm, bias=bn_bias,
                                     act=act, tm=tm, out_dtype=out_dtype)
    else:
        y = jnp.dot(wm, patches, preferred_element_type=jnp.float32)
        y = y + bn_bias[:, None]
        out = jnp.maximum(y, 0.0) if act == "relu" else jnp.tanh(y)
    return out.reshape(Cout, B, Ho, Wo)


# ----------------------------------------------------------------------------
# Generator: parameter init + jitted forward.
# ----------------------------------------------------------------------------
def init_generator_params(key, input_size, scale):
    chans = [
        (input_size + CLASS_SIZE, scale * 12),   # conv1
        (scale * 12, scale * 8),                 # conv2
        (scale * 8, scale * 4),                  # conv3
        (scale * 4, scale * 2),                  # conv4
        (scale * 2, scale),                      # conv5
        (scale, 3),                              # conv6 (no BN)
    ]
    params = []
    for li, (cin, cout) in enumerate(chans):
        k = LAYER_CFG[li][0]
        key, wk, gk, bk, mk, vk = jax.random.split(key, 6)
        w = 0.1 * jax.random.normal(wk, (cin, cout, k, k), jnp.float32)
        if li < 5:  # BatchNorm2d on layers 1..5, eval mode (running stats)
            gamma = 1.0 + 0.1 * jax.random.normal(gk, (cout,), jnp.float32)
            beta = 0.1 * jax.random.normal(bk, (cout,), jnp.float32)
            mean = 0.1 * jax.random.normal(mk, (cout,), jnp.float32)
            var = 1.0 + 0.1 * jnp.abs(jax.random.normal(vk, (cout,), jnp.float32))
            bn_scale = gamma / jnp.sqrt(var + BN_EPS)
            bn_bias = beta - mean * bn_scale
        else:
            bn_scale = jnp.ones((cout,), jnp.float32)
            bn_bias = jnp.zeros((cout,), jnp.float32)
        params.append(dict(w=w, bn_scale=bn_scale, bn_bias=bn_bias))
    return tuple(params)


@jax.jit
def generator_forward(params, x, classes):
    """x: (B, input_size) f32; classes: (B,) int -> (B, 3, 100, 100) NCHW f32."""
    emb = jax.nn.one_hot(classes.astype(jnp.int32), CLASS_SIZE, dtype=x.dtype)
    xc = jnp.concatenate([x, emb], axis=1)                 # (B, input_size + 7)
    h = xc.T.reshape(xc.shape[1], xc.shape[0], 1, 1)       # (C, B, 1, 1)

    n_layers = len(LAYER_CFG)
    for li, (k, s, p, act, use_pallas, tm) in enumerate(LAYER_CFG):
        pr = params[li]
        # conv5's Pallas output goes straight into conv6's bf16 patches, so
        # emit it in bf16 from the kernel; the final layer stays f32.
        out_dtype = jnp.bfloat16 if (use_pallas and li + 1 < n_layers) else jnp.float32
        h = conv_transpose_layer(h, pr["w"], s, p,
                                 pr["bn_scale"], pr["bn_bias"], act,
                                 use_pallas, tm, out_dtype)
    # (3, B, 100, 100) -> PyTorch NCHW (B, 3, 100, 100); tiny final shuffle.
    return jnp.transpose(h, (1, 0, 2, 3)).astype(jnp.float32)


# TODO(synk): nn.Dropout(p=0.2) and self.emb are defined in __init__ but never
# used in forward(), so they are intentionally omitted.

if __name__ == "__main__":
    input_size = 16
    scale = 4
    batch = 2

    key = jax.random.PRNGKey(0)
    pkey, xkey, ckey = jax.random.split(key, 3)

    params = init_generator_params(pkey, input_size, scale)
    x = jax.random.normal(xkey, (batch, input_size), jnp.float32)
    classes = jax.random.randint(ckey, (batch,), 0, CLASS_SIZE, jnp.int32)

    out = generator_forward(params, x, classes)
    out = jax.block_until_ready(out)

    assert out.shape == (batch, 3, 100, 100), out.shape
    assert bool(jnp.all(jnp.isfinite(out)))
    assert bool(jnp.all(jnp.abs(out) <= 1.0 + 1e-5))  # tanh range
    print("KERNEL_OK")
</pallas_src>

<mosaic_0001>
module attributes {stable_mosaic.version = 11 : i64} {
  func.func @_wm_mm_bias_act_kernel(%arg0: i32, %arg1: memref<8x128xbf16, #tpu.memory_space<vmem>>, %arg2: memref<128x1280xbf16, #tpu.memory_space<vmem>>, %arg3: memref<8x1xf32, #tpu.memory_space<vmem>>, %arg4: memref<8x1280xbf16, #tpu.memory_space<vmem>>) attributes {dimension_semantics = [#tpu.dimension_semantics<parallel>], iteration_bounds = array<i64: 4>, scalar_prefetch = 0 : i64, scratch_operands = 0 : i64, tpu.core_type = #tpu.core_type<tc>, window_params = [{pipeline_mode = #tpu.pipeline_mode<synchronous>, transform_indices = @transform_0, window_bounds = array<i64: 8, 128>}, {transform_indices = @transform_1, window_bounds = array<i64: 128, 1280>}, {pipeline_mode = #tpu.pipeline_mode<synchronous>, transform_indices = @transform_2, window_bounds = array<i64: 8, 1>}, {transform_indices = @transform_3, window_bounds = array<i64: 8, 1280>}]} {
    %c0 = arith.constant 0 : index
    %c0_0 = arith.constant 0 : index
    %0 = vector.load %arg1[%c0, %c0_0] : memref<8x128xbf16, #tpu.memory_space<vmem>>, vector<8x128xbf16>
    %c0_1 = arith.constant 0 : index
    %c0_2 = arith.constant 0 : index
    %1 = vector.load %arg2[%c0_1, %c0_2] : memref<128x1280xbf16, #tpu.memory_space<vmem>>, vector<128x1280xbf16>
    %cst = arith.constant dense<0.000000e+00> : vector<8x1280xf32>
    %2 = tpu.matmul %0, %1, %cst {dimension_numbers = #tpu.dot_dimension_numbers<[1], [0], [0], [1], [0, 0, 1, 1], [], []>} : vector<8x128xbf16>, vector<128x1280xbf16>, vector<8x1280xf32> -> vector<8x1280xf32>
    %c0_3 = arith.constant 0 : index
    %c0_4 = arith.constant 0 : index
    %3 = vector.load %arg3[%c0_3, %c0_4] : memref<8x1xf32, #tpu.memory_space<vmem>>, vector<8x1xf32>
    %4 = vector.broadcast %3 : vector<8x1xf32> to vector<8x1280xf32>
    %5 = arith.addf %2, %4 : vector<8x1280xf32>
    %cst_5 = arith.constant 0.000000e+00 : f32
    %6 = vector.broadcast %cst_5 : f32 to vector<8x1280xf32>
    %7 = arith.maximumf %5, %6 : vector<8x1280xf32>
    %8 = arith.truncf %7 : vector<8x1280xf32> to vector<8x1280xbf16>
    %c0_6 = arith.constant 0 : index
    %c0_7 = arith.constant 0 : index
    %9 = vector.load %arg4[%c0_6, %c0_7] : memref<8x1280xbf16, #tpu.memory_space<vmem>>, vector<8x1280xbf16>
    tpu.vector_store %arg4[%c0_6, %c0_7], %8 {strides = array<i32>} : memref<8x1280xbf16, #tpu.memory_space<vmem>>, vector<8x1280xbf16>,
    return
  }
  func.func @transform_0(%arg0: i32) -> (i32, i32) {
    %c0_i32 = arith.constant 0 : i32
    %c0_i32_0 = arith.constant 0 : i32
    %c0_i32_1 = arith.constant 0 : i32
    return %c0_i32, %c0_i32_0 : i32, i32
  }
  func.func @transform_1(%arg0: i32) -> (i32, i32) {
    %c0_i32 = arith.constant 0 : i32
    %c0_i32_0 = arith.constant 0 : i32
    return %c0_i32, %arg0 : i32, i32
  }
  func.func @transform_2(%arg0: i32) -> (i32, i32) {
    %c0_i32 = arith.constant 0 : i32
    %c0_i32_0 = arith.constant 0 : i32
    %c0_i32_1 = arith.constant 0 : i32
    return %c0_i32, %c0_i32_0 : i32, i32
  }
  func.func @transform_3(%arg0: i32) -> (i32, i32) {
    %c0_i32 = arith.constant 0 : i32
    %c0_i32_0 = arith.constant 0 : i32
    return %c0_i32, %arg0 : i32, i32
  }
}

module attributes {stable_mosaic.version = 11 : i64} {
  func.func @_wm_mm_bias_act_kernel(%arg0: i32, %arg1: memref<8x64xbf16, #tpu.memory_space<vmem>>, %arg2: memref<64x2560xbf16, #tpu.memory_space<vmem>>, %arg3: memref<8x1xf32, #tpu.memory_space<vmem>>, %arg4: memref<8x2560xf32, #tpu.memory_space<vmem>>) attributes {dimension_semantics = [#tpu.dimension_semantics<parallel>], iteration_bounds = array<i64: 8>, scalar_prefetch = 0 : i64, scratch_operands = 0 : i64, tpu.core_type = #tpu.core_type<tc>, window_params = [{pipeline_mode = #tpu.pipeline_mode<synchronous>, transform_indices = @transform_0, window_bounds = array<i64: 8, 64>}, {transform_indices = @transform_1, window_bounds = array<i64: 64, 2560>}, {pipeline_mode = #tpu.pipeline_mode<synchronous>, transform_indices = @transform_2, window_bounds = array<i64: 8, 1>}, {transform_indices = @transform_3, window_bounds = array<i64: 8, 2560>}]} {
    %c0 = arith.constant 0 : index
    %c0_0 = arith.constant 0 : index
    %0 = vector.load %arg1[%c0, %c0_0] : memref<8x64xbf16, #tpu.memory_space<vmem>>, vector<8x64xbf16>
    %c0_1 = arith.constant 0 : index
    %c0_2 = arith.constant 0 : index
    %1 = vector.load %arg2[%c0_1, %c0_2] : memref<64x2560xbf16, #tpu.memory_space<vmem>>, vector<64x2560xbf16>
    %cst = arith.constant dense<0.000000e+00> : vector<8x2560xf32>
    %2 = tpu.matmul %0, %1, %cst {dimension_numbers = #tpu.dot_dimension_numbers<[1], [0], [0], [1], [0, 0, 1, 1], [], []>} : vector<8x64xbf16>, vector<64x2560xbf16>, vector<8x2560xf32> -> vector<8x2560xf32>
    %c0_3 = arith.constant 0 : index
    %c0_4 = arith.constant 0 : index
    %3 = vector.load %arg3[%c0_3, %c0_4] : memref<8x1xf32, #tpu.memory_space<vmem>>, vector<8x1xf32>
    %4 = vector.broadcast %3 : vector<8x1xf32> to vector<8x2560xf32>
    %5 = arith.addf %2, %4 : vector<8x2560xf32>
    %6 = math.tanh %5 : vector<8x2560xf32>
    %c0_5 = arith.constant 0 : index
    %c0_6 = arith.constant 0 : index
    %7 = vector.load %arg4[%c0_5, %c0_6] : memref<8x2560xf32, #tpu.memory_space<vmem>>, vector<8x2560xf32>
    tpu.vector_store %arg4[%c0_5, %c0_6], %6 {strides = array<i32>} : memref<8x2560xf32, #tpu.memory_space<vmem>>, vector<8x2560xf32>,
    return
  }
  func.func @transform_0(%arg0: i32) -> (i32, i32) {
    %c0_i32 = arith.constant 0 : i32
    %c0_i32_0 = arith.constant 0 : i32
    %c0_i32_1 = arith.constant 0 : i32
    return %c0_i32, %c0_i32_0 : i32, i32
  }
  func.func @transform_1(%arg0: i32) -> (i32, i32) {
    %c0_i32 = arith.constant 0 : i32
    %c0_i32_0 = arith.constant 0 : i32
    return %c0_i32, %arg0 : i32, i32
  }
  func.func @transform_2(%arg0: i32) -> (i32, i32) {
    %c0_i32 = arith.constant 0 : i32
    %c0_i32_0 = arith.constant 0 : i32
    %c0_i32_1 = arith.constant 0 : i32
    return %c0_i32, %c0_i32_0 : i32, i32
  }
  func.func @transform_3(%arg0: i32) -> (i32, i32) {
    %c0_i32 = arith.constant 0 : i32
    %c0_i32_0 = arith.constant 0 : i32
    return %c0_i32, %arg0 : i32, i32
  }
}

</mosaic_0001>

<bundles_post_ra>
// kernel: generator_forward.2
= control target key start
LH: loop header
LB: loop body
LE: loop exit
PB: predicated region body
PF: predicated region fallthrough
CT: control target
= control target key end

     0   :  { %s1454_s12 = smov 0   ;;  %s1456_s13 = smov 0   ;;  %s1778_s0 = inlined_call_operand.vmem [shape: bf16[8,128], index: 0, kind: input, shape index: {}]   ;;  %s1779_s1 = inlined_call_operand.vmem [shape: bf16[128,5000], index: 1, kind: input, shape index: {}]   ;;  %s1780_s2 = inlined_call_operand.vmem [shape: f32[8,1], index: 2, kind: input, shape index: {}]   ;;  %s1781_s3 = inlined_call_operand.vmem [shape: bf16[8,5000], index: 3, kind: output, shape index: {}]  }
   0x1   :  { %s1458_s14 = smov 0  }
   0x2 LB: > { %s1161_s15 = sadd.s32 4294967295, %s1431_s14   ;;  %s1471_s16 = sadd.s32 1, %s1431_s14   ;;  %s1431_s14 = sphi %s1458_s14, %s1784_s14   ;;  %s1427_s13 = sphi %s1456_s13, %s1783_s13   ;;  %s1423_s12 = sphi %s1454_s12, %s1782_s12  }
   0x3   : > { %s38_s17 = ssub.s32 %s1431_s14, %s1471_s16  ;;  %s41_s18 = sadd.s32 1, %s1427_s13 }
   0x4   : > { %p39_p0 = scmp.eq.s32.totalorder %s38_s17, 0  ;;  %p48_p1 = scmp.ne.s32.totalorder %s1427_s13, %s1423_s12 }
   0x5   : > { %p49_p2 = scmp.eq.s32.totalorder %s1431_s14, 0  ;;  %p1164_p4 = scmp.ge.s32.totalorder %s1431_s14, 4 }
   0x6   : > { %s1480_s19 = scalar_select %p39_p0, %s1427_s13, %s41_s18  }
   0x7   : > { %p50_p3 = por %p49_p2, %p48_p1  ;;  %127 = sbr.rel (%p1164_p4) target bundleno = 57 (0x39), region = 24 }
   0xc   : > { %130 = sbr.rel (!%p50_p3) target bundleno = 57 (0x39), region = 28  ;;  %s132_s20 = sand.u32 (%p50_p3), 1, %s1427_s13  }
   0xd   : > { %s1255_s21 = smul.u32 (%p50_p3), 40, %s1431_s14 }
   0xe   : > { %s1261_s22 = smul.u32 (%p50_p3), 640, %s132_s20 }
   0xf   : > { %s1488_s25 = scalar_lea.vmem (%p50_p3), %s1779_s1, %s1255_s21 }
  0x10   : > { %v150_v0 = vld [vmem:[%s1488_s25] sm:$0xff] (%p50_p3)  ;;  %v152_v1 = vld [vmem:[%s1488_s25 + $0x8] sm:$0xff] (%p50_p3)  ;;  %v154_v2 = vld [vmem:[%s1488_s25 + $0x10] sm:$0xff] (%p50_p3)  ;;  %s1493_s26 = scalar_lea.vmem (%p50_p3), [#allocation2], %s1261_s22 }
  0x11   : > { %151 = vst [vmem:[%s1493_s26] sm:$0xff] %v150_v0  ;;  %153 = vst [vmem:[%s1493_s26 + $0x8] sm:$0xff] %v152_v1  ;;  %v156_v3 = vld [vmem:[%s1488_s25 + $0x18] sm:$0xff]  ;;  %v158_v4 = vld [vmem:[%s1488_s25 + $0x20] sm:$0xff] }
  0x12   : > { %155 = vst [vmem:[%s1493_s26 + $0x10] sm:$0xff] %v154_v2  ;;  %v160_v5 = vld [vmem:[%s1488_s25 + $0xa0] sm:$0xff]  ;;  %157 = vst [vmem:[%s1493_s26 + $0x18] sm:$0xff] %v156_v3  ;;  %v162_v6 = vld [vmem:[%s1488_s25 + $0xa8] sm:$0xff] }
  0x13   : > { %159 = vst [vmem:[%s1493_s26 + $0x20] sm:$0xff] %v158_v4  ;;  %161 = vst [vmem:[%s1493_s26 + $0x28] sm:$0xff] %v160_v5  ;;  %v164_v7 = vld [vmem:[%s1488_s25 + $0xb0] sm:$0xff]  ;;  %v166_v8 = vld [vmem:[%s1488_s25 + $0xb8] sm:$0xff] }
  0x14   : > { %163 = vst [vmem:[%s1493_s26 + $0x30] sm:$0xff] %v162_v6  ;;  %165 = vst [vmem:[%s1493_s26 + $0x38] sm:$0xff] %v164_v7  ;;  %v168_v9 = vld [vmem:[%s1488_s25 + $0xc0] sm:$0xff]  ;;  %v172_v11 = vld [vmem:[%s1488_s25 + $0x148] sm:$0xff] }
  0x15   : > { %167 = vst [vmem:[%s1493_s26 + $0x40] sm:$0xff] %v166_v8  ;;  %v170_v10 = vld [vmem:[%s1488_s25 + $0x140] sm:$0xff]  ;;  %169 = vst [vmem:[%s1493_s26 + $0x48] sm:$0xff] %v168_v9  ;;  %v174_v12 = vld [vmem:[%s1488_s25 + $0x150] sm:$0xff] }
  0x16   : > { %171 = vst [vmem:[%s1493_s26 + $0x50] sm:$0xff] %v170_v10  ;;  %173 = vst [vmem:[%s1493_s26 + $0x58] sm:$0xff] %v172_v11  ;;  %v176_v13 = vld [vmem:[%s1488_s25 + $0x158] sm:$0xff]  ;;  %v178_v14 = vld [vmem:[%s1488_s25 + $0x160] sm:$0xff] }
  0x17   : > { %175 = vst [vmem:[%s1493_s26 + $0x60] sm:$0xff] %v174_v12  ;;  %177 = vst [vmem:[%s1493_s26 + $0x68] sm:$0xff] %v176_v13  ;;  %v180_v15 = vld [vmem:[%s1488_s25 + $0x1e0] sm:$0xff]  ;;  %v182_v16 = vld [vmem:[%s1488_s25 + $0x1e8] sm:$0xff] }
  0x18   : > { %179 = vst [vmem:[%s1493_s26 + $0x70] sm:$0xff] %v178_v14  ;;  %v184_v17 = vld [vmem:[%s1488_s25 + $0x1f0] sm:$0xff]  ;;  %181 = vst [vmem:[%s1493_s26 + $0x78] sm:$0xff] %v180_v15  ;;  %v186_v18 = vld [vmem:[%s1488_s25 + $0x1f8] sm:$0xff] }
  0x19   : > { %183 = vst [vmem:[%s1493_s26 + $0x80] sm:$0xff] %v182_v16  ;;  %185 = vst [vmem:[%s1493_s26 + $0x88] sm:$0xff] %v184_v17  ;;  %v188_v19 = vld [vmem:[%s1488_s25 + $0x200] sm:$0xff]  ;;  %v192_v21 = vld [vmem:[%s1488_s25 + $0x288] sm:$0xff] }
  0x1a   : > { %v190_v20 = vld [vmem:[%s1488_s25 + $0x280] sm:$0xff]  ;;  %187 = vst [vmem:[%s1493_s26 + $0x90] sm:$0xff] %v186_v18  ;;  %189 = vst [vmem:[%s1493_s26 + $0x98] sm:$0xff] %v188_v19  ;;  %v194_v22 = vld [vmem:[%s1488_s25 + $0x290] sm:$0xff] }
  0x1b   : > { %191 = vst [vmem:[%s1493_s26 + $0xa0] sm:$0xff] %v190_v20  ;;  %v196_v23 = vld [vmem:[%s1488_s25 + $0x298] sm:$0xff]  ;;  %193 = vst [vmem:[%s1493_s26 + $0xa8] sm:$0xff] %v192_v21  ;;  %v198_v24 = vld [vmem:[%s1488_s25 + $0x2a0] sm:$0xff] }
  0x1c   : > { %195 = vst [vmem:[%s1493_s26 + $0xb0] sm:$0xff] %v194_v22  ;;  %197 = vst [vmem:[%s1493_s26 + $0xb8] sm:$0xff] %v196_v23  ;;  %v200_v25 = vld [vmem:[%s1488_s25 + $0x320] sm:$0xff]  ;;  %v202_v26 = vld [vmem:[%s1488_s25 + $0x328] sm:$0xff] }
  0x1d   : > { %199 = vst [vmem:[%s1493_s26 + $0xc0] sm:$0xff] %v198_v24  ;;  %201 = vst [vmem:[%s1493_s26 + $0xc8] sm:$0xff] %v200_v25  ;;  %v204_v27 = vld [vmem:[%s1488_s25 + $0x330] sm:$0xff]  ;;  %v206_v28 = vld [vmem:[%s1488_s25 + $0x338] sm:$0xff] }
  0x1e   : > { %203 = vst [vmem:[%s1493_s26 + $0xd0] sm:$0xff] %v202_v26  ;;  %v208_v29 = vld [vmem:[%s1488_s25 + $0x340] sm:$0xff]  ;;  %205 = vst [vmem:[%s1493_s26 + $0xd8] sm:$0xff] %v204_v27  ;;  %v212_v31 = vld [vmem:[%s1488_s25 + $0x3c8] sm:$0xff] }
  0x1f   : > { %207 = vst [vmem:[%s1493_s26 + $0xe0] sm:$0xff] %v206_v28  ;;  %209 = vst [vmem:[%s1493_s26 + $0xe8] sm:$0xff] %v208_v29  ;;  %v210_v30 = vld [vmem:[%s1488_s25 + $0x3c0] sm:$0xff]  ;;  %v214_v32 = vld [vmem:[%s1488_s25 + $0x3d0] sm:$0xff] }
  0x20   : > { %211 = vst [vmem:[%s1493_s26 + $0xf0] sm:$0xff] %v210_v30  ;;  %213 = vst [vmem:[%s1493_s26 + $0xf8] sm:$0xff] %v212_v31  ;;  %v216_v33 = vld [vmem:[%s1488_s25 + $0x3d8] sm:$0xff]  ;;  %v218_v34 = vld [vmem:[%s1488_s25 + $0x3e0] sm:$0xff] }
  0x21   : > { %215 = vst [vmem:[%s1493_s26 + $0x100] sm:$0xff] %v214_v32  ;;  %v220_v35 = vld [vmem:[%s1488_s25 + $0x460] sm:$0xff]  ;;  %217 = vst [vmem:[%s1493_s26 + $0x108] sm:$0xff] %v216_v33  ;;  %v222_v36 = vld [vmem:[%s1488_s25 + $0x468] sm:$0xff] }
  0x22   : > { %219 = vst [vmem:[%s1493_s26 + $0x110] sm:$0xff] %v218_v34  ;;  %221 = vst [vmem:[%s1493_s26 + $0x118] sm:$0xff] %v220_v35  ;;  %v224_v37 = vld [vmem:[%s1488_s25 + $0x470] sm:$0xff]  ;;  %v226_v38 = vld [vmem:[%s1488_s25 + $0x478] sm:$0xff] }
  0x23   : > { %223 = vst [vmem:[%s1493_s26 + $0x120] sm:$0xff] %v222_v36  ;;  %225 = vst [vmem:[%s1493_s26 + $0x128] sm:$0xff] %v224_v37  ;;  %v228_v39 = vld [vmem:[%s1488_s25 + $0x480] sm:$0xff]  ;;  %v232_v41 = vld [vmem:[%s1488_s25 + $0x508] sm:$0xff] }
  0x24   : > { %227 = vst [vmem:[%s1493_s26 + $0x130] sm:$0xff] %v226_v38  ;;  %v230_v40 = vld [vmem:[%s1488_s25 + $0x500] sm:$0xff]  ;;  %229 = vst [vmem:[%s1493_s26 + $0x138] sm:$0xff] %v228_v39  ;;  %v234_v42 = vld [vmem:[%s1488_s25 + $0x510] sm:$0xff] }
  0x25   : > { %231 = vst [vmem:[%s1493_s26 + $0x140] sm:$0xff] %v230_v40  ;;  %233 = vst [vmem:[%s1493_s26 + $0x148] sm:$0xff] %v232_v41  ;;  %v236_v43 = vld [vmem:[%s1488_s25 + $0x518] sm:$0xff]  ;;  %v238_v44 = vld [vmem:[%s1488_s25 + $0x520] sm:$0xff] }
  0x26   : > { %235 = vst [vmem:[%s1493_s26 + $0x150] sm:$0xff] %v234_v42  ;;  %237 = vst [vmem:[%s1493_s26 + $0x158] sm:$0xff] %v236_v43  ;;  %v240_v45 = vld [vmem:[%s1488_s25 + $0x5a0] sm:$0xff]  ;;  %v242_v46 = vld [vmem:[%s1488_s25 + $0x5a8] sm:$0xff] }
  0x27   : > { %239 = vst [vmem:[%s1493_s26 + $0x160] sm:$0xff] %v238_v44  ;;  %v244_v47 = vld [vmem:[%s1488_s25 + $0x5b0] sm:$0xff]  ;;  %241 = vst [vmem:[%s1493_s26 + $0x168] sm:$0xff] %v240_v45  ;;  %v246_v48 = vld [vmem:[%s1488_s25 + $0x5b8] sm:$0xff] }
  0x28   : > { %243 = vst [vmem:[%s1493_s26 + $0x170] sm:$0xff] %v242_v46  ;;  %245 = vst [vmem:[%s1493_s26 + $0x178] sm:$0xff] %v244_v47  ;;  %v248_v49 = vld [vmem:[%s1488_s25 + $0x5c0] sm:$0xff]  ;;  %v252_v51 = vld [vmem:[%s1488_s25 + $0x648] sm:$0xff] }
  0x29   : > { %v250_v50 = vld [vmem:[%s1488_s25 + $0x640] sm:$0xff]  ;;  %247 = vst [vmem:[%s1493_s26 + $0x180] sm:$0xff] %v246_v48  ;;  %249 = vst [vmem:[%s1493_s26 + $0x188] sm:$0xff] %v248_v49  ;;  %v254_v52 = vld [vmem:[%s1488_s25 + $0x650] sm:$0xff] }
  0x2a   : > { %251 = vst [vmem:[%s1493_s26 + $0x190] sm:$0xff] %v250_v50  ;;  %v256_v53 = vld [vmem:[%s1488_s25 + $0x658] sm:$0xff]  ;;  %253 = vst [vmem:[%s1493_s26 + $0x198] sm:$0xff] %v252_v51  ;;  %v258_v54 = vld [vmem:[%s1488_s25 + $0x660] sm:$0xff] }
  0x2b   : > { %255 = vst [vmem:[%s1493_s26 + $0x1a0] sm:$0xff] %v254_v52  ;;  %257 = vst [vmem:[%s1493_s26 + $0x1a8] sm:$0xff] %v256_v53  ;;  %v260_v55 = vld [vmem:[%s1488_s25 + $0x6e0] sm:$0xff]  ;;  %v262_v56 = vld [vmem:[%s1488_s25 + $0x6e8] sm:$0xff] }
  0x2c   : > { %259 = vst [vmem:[%s1493_s26 + $0x1b0] sm:$0xff] %v258_v54  ;;  %261 = vst [vmem:[%s1493_s26 + $0x1b8] sm:$0xff] %v260_v55  ;;  %v264_v57 = vld [vmem:[%s1488_s25 + $0x6f0] sm:$0xff]  ;;  %v266_v58 = vld [vmem:[%s1488_s25 + $0x6f8] sm:$0xff] }
  0x2d   : > { %263 = vst [vmem:[%s1493_s26 + $0x1c0] sm:$0xff] %v262_v56  ;;  %v268_v59 = vld [vmem:[%s1488_s25 + $0x700] sm:$0xff]  ;;  %265 = vst [vmem:[%s1493_s26 + $0x1c8] sm:$0xff] %v264_v57  ;;  %v272_v61 = vld [vmem:[%s1488_s25 + $0x788] sm:$0xff] }
  0x2e   : > { %267 = vst [vmem:[%s1493_s26 + $0x1d0] sm:$0xff] %v266_v58  ;;  %269 = vst [vmem:[%s1493_s26 + $0x1d8] sm:$0xff] %v268_v59  ;;  %v270_v60 = vld [vmem:[%s1488_s25 + $0x780] sm:$0xff]  ;;  %v274_v62 = vld [vmem:[%s1488_s25 + $0x790] sm:$0xff] }
  0x2f   : > { %271 = vst [vmem:[%s1493_s26 + $0x1e0] sm:$0xff] %v270_v60  ;;  %273 = vst [vmem:[%s1493_s26 + $0x1e8] sm:$0xff] %v272_v61  ;;  %v276_v63 = vld [vmem:[%s1488_s25 + $0x798] sm:$0xff]  ;;  %v278_v0 = vld [vmem:[%s1488_s25 + $0x7a0] sm:$0xff] }
  0x30   : > { %275 = vst [vmem:[%s1493_s26 + $0x1f0] sm:$0xff] %v274_v62  ;;  %v280_v1 = vld [vmem:[%s1488_s25 + $0x820] sm:$0xff]  ;;  %277 = vst [vmem:[%s1493_s26 + $0x1f8] sm:$0xff] %v276_v63  ;;  %v282_v2 = vld [vmem:[%s1488_s25 + $0x828] sm:$0xff] }
  0x31   : > { %279 = vst [vmem:[%s1493_s26 + $0x200] sm:$0xff] %v278_v0  ;;  %281 = vst [vmem:[%s1493_s26 + $0x208] sm:$0xff] %v280_v1  ;;  %v284_v3 = vld [vmem:[%s1488_s25 + $0x830] sm:$0xff]  ;;  %v286_v4 = vld [vmem:[%s1488_s25 + $0x838] sm:$0xff] }
  0x32   : > { %283 = vst [vmem:[%s1493_s26 + $0x210] sm:$0xff] %v282_v2  ;;  %285 = vst [vmem:[%s1493_s26 + $0x218] sm:$0xff] %v284_v3  ;;  %v288_v5 = vld [vmem:[%s1488_s25 + $0x840] sm:$0xff]  ;;  %v292_v7 = vld [vmem:[%s1488_s25 + $0x8c8] sm:$0xff] }
  0x33   : > { %287 = vst [vmem:[%s1493_s26 + $0x220] sm:$0xff] %v286_v4  ;;  %v290_v6 = vld [vmem:[%s1488_s25 + $0x8c0] sm:$0xff]  ;;  %289 = vst [vmem:[%s1493_s26 + $0x228] sm:$0xff] %v288_v5  ;;  %v294_v8 = vld [vmem:[%s1488_s25 + $0x8d0] sm:$0xff] }
  0x34   : > { %291 = vst [vmem:[%s1493_s26 + $0x230] sm:$0xff] %v290_v6  ;;  %293 = vst [vmem:[%s1493_s26 + $0x238] sm:$0xff] %v292_v7  ;;  %v296_v9 = vld [vmem:[%s1488_s25 + $0x8d8] sm:$0xff]  ;;  %v298_v10 = vld [vmem:[%s1488_s25 + $0x8e0] sm:$0xff] }
  0x35   : > { %295 = vst [vmem:[%s1493_s26 + $0x240] sm:$0xff] %v294_v8  ;;  %297 = vst [vmem:[%s1493_s26 + $0x248] sm:$0xff] %v296_v9  ;;  %v300_v11 = vld [vmem:[%s1488_s25 + $0x960] sm:$0xff]  ;;  %v302_v12 = vld [vmem:[%s1488_s25 + $0x968] sm:$0xff] }
  0x36   : > { %299 = vst [vmem:[%s1493_s26 + $0x250] sm:$0xff] %v298_v10  ;;  %v304_v13 = vld [vmem:[%s1488_s25 + $0x970] sm:$0xff]  ;;  %301 = vst [vmem:[%s1493_s26 + $0x258] sm:$0xff] %v300_v11  ;;  %v306_v14 = vld [vmem:[%s1488_s25 + $0x978] sm:$0xff] }
  0x37   : > { %303 = vst [vmem:[%s1493_s26 + $0x260] sm:$0xff] %v302_v12  ;;  %305 = vst [vmem:[%s1493_s26 + $0x268] sm:$0xff] %v304_v13  ;;  %v308_v15 = vld [vmem:[%s1488_s25 + $0x980] sm:$0xff] }
  0x38   : > { %307 = vst [vmem:[%s1493_s26 + $0x270] sm:$0xff] %v306_v14  ;;  %309 = vst [vmem:[%s1493_s26 + $0x278] sm:$0xff] %v308_v15 }
  0x39 PF: > { %p1166_p5 = scmp.ge.s32.totalorder %s1431_s14, 1  ;;  %p314_p6 = scmp.lt.s32.totalorder %s1431_s14, 5 }
  0x3b   : > { %p315_p7 = pnand %p1166_p5, %p314_p6 }
  0x3c   : > { %s321_s27 = sand.u32 (!%p315_p7), 1, %s1423_s12   ;;  %s345_s7 = smul.u32 (!%p315_p7), 10, %s1161_s15 }
  0x3d   : > { %318 = sbr.rel (%p315_p7) target bundleno = 366 (0x16e), region = 51 }
  0x3e   : > { %s1262_s30 = smul.u32 (!%p315_p7), 640, %s321_s27  ;;  %p346_p8 = scmp.lt.s32.totalorder (!%p315_p7), %s345_s7, 39 }
  0x40   : > { %s1661_s4 = scalar_lea.vmem (!%p315_p7), [#allocation2], %s1262_s30 }
  0x42   : > { %v433_v16 = vld [vmem:[%s1780_s2] sm:$0xff]  ;;  %v1433_v17 = vmov 0   ;;  %v1289_v18 = vld [vmem:[%s1661_s4 + $0x234] ss:$40 sps:$4 sm:$0xff]   ;;  %v1291_v19 = vld [vmem:[%s1661_s4 + $0x230] ss:$40 sps:$4 sm:$0xff]  }
  0x43   : > { %871 = vmatprep.mubr.bf16.mxu0 %v1433_v17  ;;  %912 = vmatprep.mubr.bf16.mxu1 %v1433_v17  ;;  %v1292_v20 = vld [vmem:[%s1661_s4 + $0x1e4] ss:$40 sps:$4 sm:$0xff]   ;;  %v1294_v21 = vld [vmem:[%s1661_s4 + $0x1e0] ss:$40 sps:$4 sm:$0xff]   ;;  %v1295_v22 = vld [vmem:[%s1661_s4 + $0x194] ss:$40 sps:$4 sm:$0xff]  }
  0x44   : > { %1288 = vset.pattern.permute.xlu0 %v1433_v17  ;;  %839 = vmatprep.subr.bf16.mxu0 %v1289_v18  ;;  %v1297_v23 = vld [vmem:[%s1661_s4 + $0x190] ss:$40 sps:$4 sm:$0xff]   ;;  %v1298_v24 = vld [vmem:[%s1661_s4 + $0x144] ss:$40 sps:$4 sm:$0xff]   ;;  %v1300_v27 = vld [vmem:[%s1661_s4 + $0x140] ss:$40 sps:$4 sm:$0xff]  }
  0x45   : > { %436 = vperm.xlu0 %1288, %v433_v16   ;;  %840 = vmatpush1.bf16.msra.mxu0 %v1291_v19  ;;  %v1310_v25 = vld [vmem:[%s1661_s4 + $0x23c] ss:$40 sps:$4 sm:$0xff]   ;;  %v1312_v26 = vld [vmem:[%s1661_s4 + $0x238] ss:$40 sps:$4 sm:$0xff]   ;;  %v1316_v29 = vld [vmem:[%s1661_s4 + $0x1ec] ss:$40 sps:$4 sm:$0xff]  }
  0x46   : > { %841 = vmatprep.subr.bf16.mxu0 %v1292_v20  ;;  %v1301_v28 = vld [vmem:[%s1661_s4 + $0xf4] ss:$40 sps:$4 sm:$0xff]   ;;  %880 = vmatprep.subr.bf16.mxu1 %v1310_v25  ;;  %v1318_v30 = vld [vmem:[%s1661_s4 + $0x1e8] ss:$40 sps:$4 sm:$0xff]   ;;  %v1304_v33 = vld [vmem:[%s1661_s4 + $0xa4] ss:$40 sps:$4 sm:$0xff]  }
  0x47   : > { %881 = vmatpush1.bf16.msra.mxu1 %v1312_v26  ;;  %v1303_v31 = vld [vmem:[%s1661_s4 + $0xf0] ss:$40 sps:$4 sm:$0xff]   ;;  %v1322_v32 = vld [vmem:[%s1661_s4 + $0x19c] ss:$40 sps:$4 sm:$0xff]   ;;  %v1328_v35 = vld [vmem:[%s1661_s4 + $0x14c] ss:$40 sps:$4 sm:$0xff]  }
  0x48   : > { %882 = vmatprep.subr.bf16.mxu1 %v1316_v29  ;;  %v1324_v34 = vld [vmem:[%s1661_s4 + $0x198] ss:$40 sps:$4 sm:$0xff]   ;;  %v1307_v37 = vld [vmem:[%s1661_s4 + $0x54] ss:$40 sps:$4 sm:$0xff]   ;;  %v1330_v38 = vld [vmem:[%s1661_s4 + $0x148] ss:$40 sps:$4 sm:$0xff]  }
  0x49   : > { %842 = vmatpush1.bf16.msra.mxu0 %v1294_v21  ;;  %v1306_v36 = vld [vmem:[%s1661_s4 + $0xa0] ss:$40 sps:$4 sm:$0xff]   ;;  %v1334_v39 = vld [vmem:[%s1661_s4 + $0xfc] ss:$40 sps:$4 sm:$0xff]   ;;  %v1309_v40 = vld [vmem:[%s1661_s4 + $0x50] ss:$40 sps:$4 sm:$0xff]  }
  0x4a   : > { %843 = vmatprep.subr.bf16.mxu0 %v1295_v22  ;;  %v1313_v41 = vld [vmem:[%s1661_s4 + $0x4] ss:$40 sps:$4 sm:$0xff]   ;;  %v1336_v42 = vld [vmem:[%s1661_s4 + $0xf8] ss:$40 sps:$4 sm:$0xff]   ;;  %v1342_v46 = vld [vmem:[%s1661_s4 + $0xa8] ss:$40 sps:$4 sm:$0xff]  }
  0x4b   : > { %883 = vmatpush1.bf16.msra.mxu1 %v1318_v30  ;;  %v1340_v43 = vld [vmem:[%s1661_s4 + $0xac] ss:$40 sps:$4 sm:$0xff]   ;;  %v1315_v44 = vld [vmem:[%s1661_s4] ss:$40 sps:$4 sm:$0xff]   ;;  %v1346_v47 = vld [vmem:[%s1661_s4 + $0x5c] ss:$40 sps:$4 sm:$0xff]  }
  0x4c   : > { %884 = vmatprep.subr.bf16.mxu1 %v1322_v32  ;;  %v1321_v45 = vld [vmem:[%s1661_s4 + $0x244] ss:$40 sps:$4 sm:$0xff]   ;;  %v1696_v48 = vld [vmem:[%s1778_s0] sm:$0xf]  ;;  %v1327_v50 = vld [vmem:[%s1661_s4 + $0x1f4] ss:$40 sps:$4 sm:$0xff]  }
  0x4d   : > { %844 = vmatpush1.bf16.msra.mxu0 %v1297_v23  ;;  %v1319_v49 = vld [vmem:[%s1661_s4 + $0x240] ss:$40 sps:$4 sm:$0xff]   ;;  %v1352_v52 = vld [vmem:[%s1661_s4 + $0xc] ss:$40 sps:$4 sm:$0xff]   ;;  %v1325_v53 = vld [vmem:[%s1661_s4 + $0x1f0] ss:$40 sps:$4 sm:$0xff]  }
  0x4e   : > { %845 = vmatprep.subr.bf16.mxu0 %v1298_v24  ;;  %v1348_v51 = vld [vmem:[%s1661_s4 + $0x58] ss:$40 sps:$4 sm:$0xff]   ;;  %v1333_v54 = vld [vmem:[%s1661_s4 + $0x1a4] ss:$40 sps:$4 sm:$0xff]   ;;  %v1354_v55 = vld [vmem:[%s1661_s4 + $0x8] ss:$40 sps:$4 sm:$0xff]  }
  0x4f   : > { %885 = vmatpush1.bf16.msra.mxu1 %v1324_v34  ;;  %v1360_v56 = vld [vmem:[%s1661_s4 + $0x24c] ss:$40 sps:$4 sm:$0xff]   ;;  %v1331_v57 = vld [vmem:[%s1661_s4 + $0x1a0] ss:$40 sps:$4 sm:$0xff]   ;;  %v1366_v60 = vld [vmem:[%s1661_s4 + $0x1fc] ss:$40 sps:$4 sm:$0xff]  }
  0x50   : > { %886 = vmatprep.subr.bf16.mxu1 %v1328_v35  ;;  %v1339_v58 = vld [vmem:[%s1661_s4 + $0x154] ss:$40 sps:$4 sm:$0xff]   ;;  %v1358_v59 = vld [vmem:[%s1661_s4 + $0x248] ss:$40 sps:$4 sm:$0xff]   ;;  %v1345_v62 = vld [vmem:[%s1661_s4 + $0x104] ss:$40 sps:$4 sm:$0xff]  }
  0x51   : > { %846 = vmatpush1.bf16.msra.mxu0 %v1300_v27  ;;  %v1337_v61 = vld [vmem:[%s1661_s4 + $0x150] ss:$40 sps:$4 sm:$0xff]   ;;  %v1372_v0 = vld [vmem:[%s1661_s4 + $0x1ac] ss:$40 sps:$4 sm:$0xff]   ;;  %v1343_v1 = vld [vmem:[%s1661_s4 + $0x100] ss:$40 sps:$4 sm:$0xff]  }
  0x52   : > { %847 = vmatprep.subr.bf16.mxu0 %v1301_v28  ;;  %v1364_v63 = vld [vmem:[%s1661_s4 + $0x1f8] ss:$40 sps:$4 sm:$0xff]   ;;  %v1351_v2 = vld [vmem:[%s1661_s4 + $0xb4] ss:$40 sps:$4 sm:$0xff]   ;;  %v1370_v3 = vld [vmem:[%s1661_s4 + $0x1a8] ss:$40 sps:$4 sm:$0xff]  }
  0x53   : > { %887 = vmatpush1.bf16.msra.mxu1 %v1330_v38  ;;  %v1378_v4 = vld [vmem:[%s1661_s4 + $0x15c] ss:$40 sps:$4 sm:$0xff]   ;;  %v1349_v5 = vld [vmem:[%s1661_s4 + $0xb0] ss:$40 sps:$4 sm:$0xff]   ;;  %v1384_v8 = vld [vmem:[%s1661_s4 + $0x10c] ss:$40 sps:$4 sm:$0xff]  }
  0x54   : > { %888 = vmatprep.subr.bf16.mxu1 %v1334_v39  ;;  %v1357_v6 = vld [vmem:[%s1661_s4 + $0x64] ss:$40 sps:$4 sm:$0xff]   ;;  %v1376_v7 = vld [vmem:[%s1661_s4 + $0x158] ss:$40 sps:$4 sm:$0xff]   ;;  %v1363_v10 = vld [vmem:[%s1661_s4 + $0x14] ss:$40 sps:$4 sm:$0xff]  }
  0x55   : > { %848 = vmatpush1.bf16.msra.mxu0 %v1303_v31  ;;  %v1355_v9 = vld [vmem:[%s1661_s4 + $0x60] ss:$40 sps:$4 sm:$0xff]   ;;  %v1390_v12 = vld [vmem:[%s1661_s4 + $0xbc] ss:$40 sps:$4 sm:$0xff]   ;;  %v1361_v13 = vld [vmem:[%s1661_s4 + $0x10] ss:$40 sps:$4 sm:$0xff]  }
  0x56   : > { %849 = vmatprep.subr.bf16.mxu0 %v1304_v33  ;;  %v1382_v11 = vld [vmem:[%s1661_s4 + $0x108] ss:$40 sps:$4 sm:$0xff]   ;;  %v1369_v14 = vld [vmem:[%s1661_s4 + $0x254] ss:$40 sps:$4 sm:$0xff]   ;;  %v1388_v15 = vld [vmem:[%s1661_s4 + $0xb8] ss:$40 sps:$4 sm:$0xff]  }
  0x57   : > { %889 = vmatpush1.bf16.msra.mxu1 %v1336_v42  ;;  %v1396_v16 = vld [vmem:[%s1661_s4 + $0x6c] ss:$40 sps:$4 sm:$0xff]   ;;  %v1367_v18 = vld [vmem:[%s1661_s4 + $0x250] ss:$40 sps:$4 sm:$0xff]   ;;  %v1402_v21 = vld [vmem:[%s1661_s4 + $0x1c] ss:$40 sps:$4 sm:$0xff]  }
  0x58   : > { %890 = vmatprep.subr.bf16.mxu1 %v1340_v43  ;;  %v1375_v19 = vld [vmem:[%s1661_s4 + $0x204] ss:$40 sps:$4 sm:$0xff]   ;;  %v1394_v20 = vld [vmem:[%s1661_s4 + $0x68] ss:$40 sps:$4 sm:$0xff]   ;;  %v1381_v23 = vld [vmem:[%s1661_s4 + $0x1b4] ss:$40 sps:$4 sm:$0xff]  }
  0x59   : > { %850 = vmatpush1.bf16.msra.mxu0 %v1306_v36  ;;  %v1373_v22 = vld [vmem:[%s1661_s4 + $0x200] ss:$40 sps:$4 sm:$0xff]   ;;  %v1379_v25 = vld [vmem:[%s1661_s4 + $0x1b0] ss:$40 sps:$4 sm:$0xff]   ;;  %v1387_v26 = vld [vmem:[%s1661_s4 + $0x164] ss:$40 sps:$4 sm:$0xff]  }
  0x5a   : > { %851 = vmatprep.subr.bf16.mxu0 %v1307_v37  ;;  %v1400_v24 = vld [vmem:[%s1661_s4 + $0x18] ss:$40 sps:$4 sm:$0xff]   ;;  %v1399_v29 = vld [vmem:[%s1661_s4 + $0xc4] ss:$40 sps:$4 sm:$0xff]   ;;  %v1405_v31 = vld [vmem:[%s1661_s4 + $0x74] ss:$40 sps:$4 sm:$0xff]  }
  0x5b   : > { %891 = vmatpush1.bf16.msra.mxu1 %v1342_v46  ;;  %v1385_v27 = vld [vmem:[%s1661_s4 + $0x160] ss:$40 sps:$4 sm:$0xff]   ;;  %v1391_v28 = vld [vmem:[%s1661_s4 + $0x110] ss:$40 sps:$4 sm:$0xff]   ;;  %v1408_v33 = vld [vmem:[%s1661_s4 + $0x24] ss:$40 sps:$4 sm:$0xff]  }
  0x5c   : > { %892 = vmatprep.subr.bf16.mxu1 %v1346_v47  ;;  %v1397_v30 = vld [vmem:[%s1661_s4 + $0xc0] ss:$40 sps:$4 sm:$0xff]   ;;  %v1403_v32 = vld [vmem:[%s1661_s4 + $0x70] ss:$40 sps:$4 sm:$0xff]   ;;  %s1786_s7 = smov (!%p346_p8, %s345_s7), 39 }
  0x5d   : > { %852 = vmatpush1.bf16.msra.mxu0 %v1309_v40  ;;  %v1406_v34 = vld [vmem:[%s1661_s4 + $0x20] ss:$40 sps:$4 sm:$0xff]   ;;  %s1167_s8 = sshll.u32 %s1786_s7, 2 }
  0x5e   : > { %853 = vmatprep.subr.bf16.mxu0 %v1313_v41  ;;  %s1761_s11 = scalar_lea.vmem %s1781_s3, %s1167_s8 }
  0x5f   : > { %893 = vmatpush1.bf16.msra.mxu1 %v1348_v51 }
  0x60   : > { %894 = vmatprep.subr.bf16.mxu1 %v1352_v52 }
  0x61   : > { %854 = vmatpush1.bf16.msra.mxu0 %v1315_v44 }
  0x62   : > { %921 = vmatprep.subr.bf16.mxu0 %v1321_v45 }
  0x63   : > { %895 = vmatpush1.bf16.msra.mxu1 %v1354_v55 }
  0x64   : > { %872 = vmatmul.mubr.bf16.vlgmr.msra.gmra.mxu0 %v1696_v48  ;;  %962 = vmatprep.subr.bf16.mxu1 %v1360_v56 }
  0x65   : > { %922 = vmatpush1.bf16.msra.mxu0 %v1319_v49  ;;  %953 = vmatprep.mubr.bf16.mxu0 %v1433_v17 }
  0x66   : > { %923 = vmatprep.subr.bf16.mxu0 %v1327_v50  ;;  %913 = vmatmul.mubr.bf16.vlgmr.msra.gmra.mxu1 %v1696_v48 }
  0x67   : > { %963 = vmatpush1.bf16.msra.mxu1 %v1358_v59  ;;  %994 = vmatprep.mubr.bf16.mxu1 %v1433_v17 }
  0x68   : > { %964 = vmatprep.subr.bf16.mxu1 %v1366_v60 }
  0x69   : > { %924 = vmatpush1.bf16.msra.mxu0 %v1325_v53 }
  0x6a   : > { %925 = vmatprep.subr.bf16.mxu0 %v1333_v54 }
  0x6b   : > { %965 = vmatpush1.bf16.msra.mxu1 %v1364_v63 }
  0x6c   : > { %966 = vmatprep.subr.bf16.mxu1 %v1372_v0 }
  0x6d   : > { %926 = vmatpush1.bf16.msra.mxu0 %v1331_v57 }
  0x6e   : > { %927 = vmatprep.subr.bf16.mxu0 %v1339_v58 }
  0x6f   : > { %967 = vmatpush1.bf16.msra.mxu1 %v1370_v3 }
  0x70   : > { %968 = vmatprep.subr.bf16.mxu1 %v1378_v4 }
  0x71   : > { %928 = vmatpush1.bf16.msra.mxu0 %v1337_v61 }
  0x72   : > { %929 = vmatprep.subr.bf16.mxu0 %v1345_v62 }
  0x73   : > { %969 = vmatpush1.bf16.msra.mxu1 %v1376_v7 }
  0x74   : > { %970 = vmatprep.subr.bf16.mxu1 %v1384_v8 }
  0x75   : > { %930 = vmatpush1.bf16.msra.mxu0 %v1343_v1 }
  0x76   : > { %931 = vmatprep.subr.bf16.mxu0 %v1351_v2 }
  0x77   : > { %971 = vmatpush1.bf16.msra.mxu1 %v1382_v11 }
  0x78   : > { %972 = vmatprep.subr.bf16.mxu1 %v1390_v12 }
  0x79   : > { %932 = vmatpush1.bf16.msra.mxu0 %v1349_v5 }
  0x7a   : > { %933 = vmatprep.subr.bf16.mxu0 %v1357_v6 }
  0x7b   : > { %973 = vmatpush1.bf16.msra.mxu1 %v1388_v15 }
  0x7c   : > { %974 = vmatprep.subr.bf16.mxu1 %v1396_v16 }
  0x7d   : > { %934 = vmatpush1.bf16.msra.mxu0 %v1355_v9 }
  0x7e   : > { %935 = vmatprep.subr.bf16.mxu0 %v1363_v10 }
  0x7f   : > { %975 = vmatpush1.bf16.msra.mxu1 %v1394_v20 }
  0x80   : > { %976 = vmatprep.subr.bf16.mxu1 %v1402_v21 }
  0x81   : > { %936 = vmatpush1.bf16.msra.mxu0 %v1361_v13 }
  0x82   : > { %1003 = vmatprep.subr.bf16.mxu0 %v1369_v14 }
  0x83   : > { %977 = vmatpush1.bf16.msra.mxu1 %v1400_v24 }
  0x84   : > { %954 = vmatmul.mubr.bf16.vlgmr.msra.gmra.mxu0 %v1696_v48 }
  0x85   : > { %1004 = vmatpush1.bf16.msra.mxu0 %v1367_v18  ;;  %1035 = vmatprep.mubr.bf16.mxu0 %v1433_v17  ;;  %v1393_v17 = vld [vmem:[%s1661_s4 + $0x114] ss:$40 sps:$4 sm:$0xff]  }
  0x86   : > { %1005 = vmatprep.subr.bf16.mxu0 %v1375_v19  ;;  %995 = vmatmul.mubr.bf16.vlgmr.msra.gmra.mxu1 %v1696_v48 }
  0x89   : > { %1006 = vmatpush1.bf16.msra.mxu0 %v1373_v22 }
  0x8a   : > { %1007 = vmatprep.subr.bf16.mxu0 %v1381_v23 }
  0x8d   : > { %1008 = vmatpush1.bf16.msra.mxu0 %v1379_v25 }
  0x8e   : > { %1009 = vmatprep.subr.bf16.mxu0 %v1387_v26 }
  0x91   : > { %1010 = vmatpush1.bf16.msra.mxu0 %v1385_v27 }
  0x92   : > { %1011 = vmatprep.subr.bf16.mxu0 %v1393_v17 }
  0x95   : > { %1012 = vmatpush1.bf16.msra.mxu0 %v1391_v28 }
  0x96   : > { %1013 = vmatprep.subr.bf16.mxu0 %v1399_v29 }
  0x99   : > { %1014 = vmatpush1.bf16.msra.mxu0 %v1397_v30 }
  0x9a   : > { %1015 = vmatprep.subr.bf16.mxu0 %v1405_v31 }
  0x9d   : > { %1016 = vmatpush1.bf16.msra.mxu0 %v1403_v32 }
  0x9e   : > { %1017 = vmatprep.subr.bf16.mxu0 %v1408_v33 }
  0xa1   : > { %1018 = vmatpush1.bf16.msra.mxu0 %v1406_v34 }
  0xa4   : > { %1036 = vmatmul.mubr.bf16.vlgmr.msra.gmra.mxu0 %v1696_v48 }
  0xc0   : > { %v437_v35 = vpop.permute.xlu0 %436 }
 0x124   : > { %v873_v36 = vpop.f32.mrf.mxu0 }
 0x125   : > { %v874_v37 = vadd.f32 %v873_v36, %v437_v35 }
 0x126   : > { %v875_v38 = vpop.f32.mrf.mxu0  ;;  %v914_v45 = vpop.f32.mrf.mxu1 }
 0x127   : > { %v876_v39 = vadd.f32 %v875_v38, %v437_v35  ;;  %v1044_v40 = vmax.f32 %v874_v37, 0.0  ;;  %v915_v46 = vadd.f32 %v914_v45, %v437_v35 }
 0x128   : > { %v877_v41 = vpop.f32.mrf.mxu0  ;;  %v916_v47 = vpop.f32.mrf.mxu1 }
 0x129   : > { %v1045_v42 = vmax.f32 %v876_v39, 0.0  ;;  %v1046_v48 = vmax.f32 %v915_v46, 0.0  ;;  %v917_v49 = vadd.f32 %v916_v47, %v437_v35 }
 0x12a   : > { %v878_v43 = vpop.f32.mrf.mxu0  ;;  %v918_v50 = vpop.f32.mrf.mxu1 }
 0x12b   : > { %v1256_v44 = vpack.c.bf16 %v1045_v42, %v1044_v40  ;;  %v1047_v51 = vmax.f32 %v917_v49, 0.0 }
 0x12c   : > { %v919_v52 = vpop.f32.mrf.mxu1 }
 0x12d   : > { %1094 = vst [vmem:[%s1761_s11] sm:$0xff] %v1256_v44  ;;  %v1257_v53 = vpack.c.bf16 %v1047_v51, %v1046_v48 }
 0x12f   : > { %1095 = vst [vmem:[%s1761_s11 + $0x8] sm:$0xff] %v1257_v53 }
 0x144   : > { %v955_v54 = vpop.f32.mrf.mxu0 }
 0x145   : > { %v956_v55 = vadd.f32 %v955_v54, %v437_v35 }
 0x146   : > { %v957_v56 = vpop.f32.mrf.mxu0  ;;  %v996_v63 = vpop.f32.mrf.mxu1 }
 0x147   : > { %v1048_v57 = vmax.f32 %v956_v55, 0.0  ;;  %v958_v58 = vadd.f32 %v957_v56, %v437_v35  ;;  %v997_v0 = vadd.f32 %v996_v63, %v437_v35 }
 0x148   : > { %v959_v59 = vpop.f32.mrf.mxu0  ;;  %v998_v1 = vpop.f32.mrf.mxu1 }
 0x149   : > { %v1049_v60 = vmax.f32 %v958_v58, 0.0  ;;  %v1050_v2 = vmax.f32 %v997_v0, 0.0  ;;  %v999_v3 = vadd.f32 %v998_v1, %v437_v35 }
 0x14a   : > { %v960_v61 = vpop.f32.mrf.mxu0  ;;  %v1000_v4 = vpop.f32.mrf.mxu1 }
 0x14b   : > { %v1258_v62 = vpack.c.bf16 %v1049_v60, %v1048_v57  ;;  %v1051_v5 = vmax.f32 %v999_v3, 0.0 }
 0x14c   : > { %v1001_v6 = vpop.f32.mrf.mxu1 }
 0x14d   : > { %1096 = vst [vmem:[%s1761_s11 + $0x10] sm:$0xff] %v1258_v62  ;;  %v1259_v7 = vpack.c.bf16 %v1051_v5, %v1050_v2 }
 0x14f   : > { %1097 = vst [vmem:[%s1761_s11 + $0x18] sm:$0xff] %v1259_v7 }
 0x164   : > { %v1037_v8 = vpop.f32.mrf.mxu0 }
 0x165   : > { %v1038_v9 = vadd.f32 %v1037_v8, %v437_v35 }
 0x166   : > { %v1039_v10 = vpop.f32.mrf.mxu0 }
 0x167   : > { %v1040_v11 = vadd.f32 %v1039_v10, %v437_v35  ;;  %v1052_v13 = vmax.f32 %v1038_v9, 0.0 }
 0x168   : > { %v1041_v12 = vpop.f32.mrf.mxu0 }
 0x169   : > { %v1053_v14 = vmax.f32 %v1040_v11, 0.0 }
 0x16a   : > { %v1042_v15 = vpop.f32.mrf.mxu0 }
 0x16b   : > { %v1260_v16 = vpack.c.bf16 %v1053_v14, %v1052_v13 }
 0x16d   : > { %1098 = vst [vmem:[%s1761_s11 + $0x20] sm:$0xff] %v1260_v16 }
 0x16e PF: > { %p10_p9 = scmp.ge.s32.totalorder %s1471_s16, 6   ;;  %s1782_s12 = smov %s1427_s13 }
 0x16f   : > { %s1783_s13 = smov %s1480_s19  ;;  %s1784_s14 = smov %s1471_s16 }
 0x170   :  { %12 = sbr.rel (!%p10_p9) target bundleno = 2 (0x2), region = 90 }

// kernel: generator_forward.3
= control target key start
LH: loop header
LB: loop body
LE: loop exit
PB: predicated region body
PF: predicated region fallthrough
CT: control target
= control target key end

     0   :  { %s3137_s12 = smov 0   ;;  %s3139_s13 = smov 0   ;;  %s4260_s0 = inlined_call_operand.vmem [shape: bf16[8,64], index: 0, kind: input, shape index: {}]   ;;  %s4261_s1 = inlined_call_operand.vmem [shape: bf16[64,20000], index: 1, kind: input, shape index: {}]   ;;  %s4262_s2 = inlined_call_operand.vmem [shape: f32[8,1], index: 2, kind: input, shape index: {}]   ;;  %s4263_s3 = inlined_call_operand.vmem [shape: f32[8,20000], index: 3, kind: output, shape index: {}]  }
   0x1   :  { %s3141_s14 = smov 0  }
   0x2 LB: > { %s3153_s15 = sadd.s32 4294967295, %s2982_s14   ;;  %s3156_s16 = sadd.s32 1, %s2982_s14   ;;  %s2982_s14 = sphi %s3141_s14, %s4293_s14   ;;  %s2978_s13 = sphi %s3139_s13, %s4292_s13   ;;  %s2974_s12 = sphi %s3137_s12, %s4291_s12  }
   0x3   : > { %s38_s17 = ssub.s32 %s2982_s14, %s3156_s16  ;;  %s41_s18 = sadd.s32 1, %s2978_s13 }
   0x4   : > { %p39_p0 = scmp.eq.s32.totalorder %s38_s17, 0  ;;  %p48_p1 = scmp.ne.s32.totalorder %s2978_s13, %s2974_s12 }
   0x5   : > { %p49_p2 = scmp.eq.s32.totalorder %s2982_s14, 0  ;;  %p99_p3 = scmp.eq.s32.totalorder %s3153_s15, 7 }
   0x6   : > { %s3166_s19 = scalar_select %p39_p0, %s2978_s13, %s41_s18  }
   0x7   : > { %p50_p4 = por %p49_p2, %p48_p1  ;;  %p3168_p5 = por %p99_p3, %p48_p1 }
   0x8   : > { %p2225_p6 = scmp.ge.s32.totalorder %s2982_s14, 8 }
   0xa   : > { %127 = sbr.rel (%p2225_p6) target bundleno = 179 (0xb3), region = 24 }
   0xf   : > { %130 = sbr.rel (!%p50_p4) target bundleno = 179 (0xb3), region = 28  ;;  %s132_s21 = sand.u32 (%p50_p4), 1, %s2978_s13  }
  0x10   : > { %s135_s22 = smul.u32 (%p50_p4), 20, %s2982_s14 }
  0x11   : > { %s2383_s23 = smul.u32 (%p50_p4), 640, %s132_s21 }
  0x12   : > { %s136_s24 = ssub.s32 (%p50_p4), 157, %s135_s22  ;;  %s2373_s25 = smul.u32 (%p50_p4), 80, %s2982_s14 }
  0x13   : > { %p137_p7 = scmp.lt.s32.totalorder (%p50_p4), %s136_s24, 20  ;;  %s3183_s4 = scalar_lea.vmem (%p50_p4), [#allocation2], %s2383_s23  }
  0x14   : > { %s3179_s28 = scalar_lea.vmem %s4261_s1, %s2373_s25  }
  0x15   : > { %s4295_s24 = smov (!%p137_p7, %s136_s24), 20 }
  0x16   : > { %s2226_s29 = sshll.u32 %s4295_s24, 9  ;;  %s3181_s30 = sshll.u32 %s4295_s24, 2 }
  0x17   : > { %p2230_p8 = scmp.eq.s32.totalorder %s2226_s29, 0 }
  0x18   : > { %p147_p9 = scmp.lt.u32.totalorder (!%p2230_p8), %s3181_s30, 8 }
  0x19   : > { %146 = sbr.rel (%p2230_p8) target bundleno = 179 (0xb3), region = 32 }
  0x1e   : > { %150 = sbr.rel (%p147_p9) target bundleno = 164 (0xa4), region = 36  ;;  %s3187_s5 = sand.u32 (!%p147_p9), 7, %s3181_s30  }
  0x1f   : > { %p181_p10 = scmp.eq.s32.totalorder (!%p147_p9), %s3187_s5, 0  ;;  %p2231_p11 = scmp.ne.s32.totalorder (!%p147_p9), %s3187_s5, 0 }
  0x23   : > { %184 = sbr.rel (%p2231_p11) target bundleno = 94 (0x5e), region = 51  ;;  %s185_s6 = sshrl.u32 (!%p2231_p11), %s3181_s30, 3 }
  0x24   : > { %s3194_s7 = sshrl.u32 (!%p2231_p11), %s185_s6, 3 }
  0x25   : > { %p2232_p12 = scmp.le.s32.totalorder (!%p2231_p11), %s3194_s7, 0 }
  0x28   : > { %2095 = sbr.rel (%p2232_p12) target bundleno = 78 (0x4e), region = 229  ;;  %s4265_s8 = smov (!%p2232_p12), %s3183_s4 }
  0x29   : > { %s4266_s9 = smov (!%p2232_p12), %s3179_s28  ;;  %s3203_s10 = smov (!%p2232_p12), 0  }
  0x2a   : > { %s3205_s11 = smov (!%p2232_p12), 0  }
  0x2d LB: >> { %v198_v0 = vld [vmem:[%s2990_s9] sm:$0xff]  ;;  %v200_v1 = vld [vmem:[%s2990_s9 + $0x8] sm:$0xff]  ;;  %v202_v2 = vld [vmem:[%s2990_s9 + $0x10] sm:$0xff]  ;;  %s326_s17 = sadd.s32 1, %s2994_s10  ;;  %s192_s11 = sadd.s32 1, %s2998_s11   ;;  %s2998_s11 = sphi %s3205_s11, %s192_s11   ;;  %s2994_s10 = sphi %s3203_s10, %s4269_s10   ;;  %s2990_s9 = sphi %s4266_s9, %s4268_s9   ;;  %s2986_s8 = sphi %s4265_s8, %s4267_s8  }
  0x2e   : >> { %199 = vst [vmem:[%s2986_s8] sm:$0xff] %v198_v0  ;;  %201 = vst [vmem:[%s2986_s8 + $0x8] sm:$0xff] %v200_v1  ;;  %v204_v3 = vld [vmem:[%s2990_s9 + $0x18] sm:$0xff]  ;;  %v206_v4 = vld [vmem:[%s2990_s9 + $0x20] sm:$0xff]  ;;  %p327_p13 = scmp.ge.s32.totalorder %s326_s17, %s3194_s7  ;;  %p191_p0 = scmp.ge.s32.totalorder %s192_s11, %s3194_s7 }
  0x2f   : >> { %203 = vst [vmem:[%s2986_s8 + $0x10] sm:$0xff] %v202_v2  ;;  %v208_v5 = vld [vmem:[%s2990_s9 + $0x28] sm:$0xff]  ;;  %205 = vst [vmem:[%s2986_s8 + $0x18] sm:$0xff] %v204_v3  ;;  %v210_v6 = vld [vmem:[%s2990_s9 + $0x30] sm:$0xff] }
  0x30   : >> { %207 = vst [vmem:[%s2986_s8 + $0x20] sm:$0xff] %v206_v4  ;;  %209 = vst [vmem:[%s2986_s8 + $0x28] sm:$0xff] %v208_v5  ;;  %v212_v7 = vld [vmem:[%s2990_s9 + $0x38] sm:$0xff]  ;;  %v218_v10 = vld [vmem:[%s2990_s9 + $0x284] sm:$0xff]  ;;  %s4297_s17 = smov (%p327_p13, %s326_s17), 0 }
  0x31   : >> { %v214_v8 = vld [vmem:[%s2990_s9 + $0x274] sm:$0xff]  ;;  %211 = vst [vmem:[%s2986_s8 + $0x30] sm:$0xff] %v210_v6  ;;  %213 = vst [vmem:[%s2986_s8 + $0x38] sm:$0xff] %v212_v7  ;;  %v216_v9 = vld [vmem:[%s2990_s9 + $0x27c] sm:$0xff]  ;;  %s2233_s18 = sshll.u32 %s4297_s17, 6  ;;  %s4269_s10 = smov %s4297_s17 }
  0x32   : >> { %215 = vst [vmem:[%s2986_s8 + $0x50] sm:$0xff] %v214_v8  ;;  %v220_v11 = vld [vmem:[%s2990_s9 + $0x28c] sm:$0xff]  ;;  %217 = vst [vmem:[%s2986_s8 + $0x58] sm:$0xff] %v216_v9  ;;  %v222_v12 = vld [vmem:[%s2990_s9 + $0x294] sm:$0xff]  ;;  %s3261_s21 = scalar_lea.vmem %s3179_s28, %s2233_s18   ;;  %s3264_s22 = scalar_lea.vmem %s3183_s4, %s2233_s18 [#allocation2]  }
  0x33   : >> { %219 = vst [vmem:[%s2986_s8 + $0x60] sm:$0xff] %v218_v10  ;;  %221 = vst [vmem:[%s2986_s8 + $0x68] sm:$0xff] %v220_v11  ;;  %v224_v13 = vld [vmem:[%s2990_s9 + $0x29c] sm:$0xff]  ;;  %v226_v14 = vld [vmem:[%s2990_s9 + $0x2a4] sm:$0xff] }
  0x34   : >> { %223 = vst [vmem:[%s2986_s8 + $0x70] sm:$0xff] %v222_v12  ;;  %225 = vst [vmem:[%s2986_s8 + $0x78] sm:$0xff] %v224_v13  ;;  %v228_v15 = vld [vmem:[%s2990_s9 + $0x2ac] sm:$0xff]  ;;  %v234_v18 = vld [vmem:[%s2990_s9 + $0x4f8] sm:$0xff] }
  0x35   : >> { %227 = vst [vmem:[%s2986_s8 + $0x80] sm:$0xff] %v226_v14  ;;  %v230_v16 = vld [vmem:[%s2990_s9 + $0x4e8] sm:$0xff]  ;;  %v232_v17 = vld [vmem:[%s2990_s9 + $0x4f0] sm:$0xff]  ;;  %229 = vst [vmem:[%s2986_s8 + $0x88] sm:$0xff] %v228_v15 }
  0x36   : >> { %231 = vst [vmem:[%s2986_s8 + $0xa0] sm:$0xff] %v230_v16  ;;  %233 = vst [vmem:[%s2986_s8 + $0xa8] sm:$0xff] %v232_v17  ;;  %v236_v19 = vld [vmem:[%s2990_s9 + $0x500] sm:$0xff]  ;;  %v238_v20 = vld [vmem:[%s2990_s9 + $0x508] sm:$0xff] }
  0x37   : >> { %235 = vst [vmem:[%s2986_s8 + $0xb0] sm:$0xff] %v234_v18  ;;  %237 = vst [vmem:[%s2986_s8 + $0xb8] sm:$0xff] %v236_v19  ;;  %v240_v21 = vld [vmem:[%s2990_s9 + $0x510] sm:$0xff]  ;;  %v242_v22 = vld [vmem:[%s2990_s9 + $0x518] sm:$0xff] }
  0x38   : >> { %239 = vst [vmem:[%s2986_s8 + $0xc0] sm:$0xff] %v238_v20  ;;  %v244_v23 = vld [vmem:[%s2990_s9 + $0x520] sm:$0xff]  ;;  %241 = vst [vmem:[%s2986_s8 + $0xc8] sm:$0xff] %v240_v21  ;;  %v250_v26 = vld [vmem:[%s2990_s9 + $0x76c] sm:$0xff] }
  0x39   : >> { %243 = vst [vmem:[%s2986_s8 + $0xd0] sm:$0xff] %v242_v22  ;;  %245 = vst [vmem:[%s2986_s8 + $0xd8] sm:$0xff] %v244_v23  ;;  %v246_v24 = vld [vmem:[%s2990_s9 + $0x75c] sm:$0xff]  ;;  %v248_v25 = vld [vmem:[%s2990_s9 + $0x764] sm:$0xff] }
  0x3a   : >> { %247 = vst [vmem:[%s2986_s8 + $0xf0] sm:$0xff] %v246_v24  ;;  %249 = vst [vmem:[%s2986_s8 + $0xf8] sm:$0xff] %v248_v25  ;;  %v252_v27 = vld [vmem:[%s2990_s9 + $0x774] sm:$0xff]  ;;  %v254_v28 = vld [vmem:[%s2990_s9 + $0x77c] sm:$0xff] }
  0x3b   : >> { %251 = vst [vmem:[%s2986_s8 + $0x100] sm:$0xff] %v250_v26  ;;  %v256_v29 = vld [vmem:[%s2990_s9 + $0x784] sm:$0xff]  ;;  %253 = vst [vmem:[%s2986_s8 + $0x108] sm:$0xff] %v252_v27  ;;  %v258_v30 = vld [vmem:[%s2990_s9 + $0x78c] sm:$0xff] }
  0x3c   : >> { %255 = vst [vmem:[%s2986_s8 + $0x110] sm:$0xff] %v254_v28  ;;  %257 = vst [vmem:[%s2986_s8 + $0x118] sm:$0xff] %v256_v29  ;;  %v260_v31 = vld [vmem:[%s2990_s9 + $0x794] sm:$0xff]  ;;  %v266_v34 = vld [vmem:[%s2990_s9 + $0x9e0] sm:$0xff] }
  0x3d   : >> { %v262_v32 = vld [vmem:[%s2990_s9 + $0x9d0] sm:$0xff]  ;;  %259 = vst [vmem:[%s2986_s8 + $0x120] sm:$0xff] %v258_v30  ;;  %261 = vst [vmem:[%s2986_s8 + $0x128] sm:$0xff] %v260_v31  ;;  %v264_v33 = vld [vmem:[%s2990_s9 + $0x9d8] sm:$0xff] }
  0x3e   : >> { %263 = vst [vmem:[%s2986_s8 + $0x140] sm:$0xff] %v262_v32  ;;  %v268_v35 = vld [vmem:[%s2990_s9 + $0x9e8] sm:$0xff]  ;;  %265 = vst [vmem:[%s2986_s8 + $0x148] sm:$0xff] %v264_v33  ;;  %v270_v36 = vld [vmem:[%s2990_s9 + $0x9f0] sm:$0xff] }
  0x3f   : >> { %267 = vst [vmem:[%s2986_s8 + $0x150] sm:$0xff] %v266_v34  ;;  %269 = vst [vmem:[%s2986_s8 + $0x158] sm:$0xff] %v268_v35  ;;  %v272_v37 = vld [vmem:[%s2990_s9 + $0x9f8] sm:$0xff]  ;;  %v274_v38 = vld [vmem:[%s2990_s9 + $0xa00] sm:$0xff] }
  0x40   : >> { %271 = vst [vmem:[%s2986_s8 + $0x160] sm:$0xff] %v270_v36  ;;  %273 = vst [vmem:[%s2986_s8 + $0x168] sm:$0xff] %v272_v37  ;;  %v276_v39 = vld [vmem:[%s2990_s9 + $0xa08] sm:$0xff]  ;;  %v282_v42 = vld [vmem:[%s2990_s9 + $0xc54] sm:$0xff] }
  0x41   : >> { %275 = vst [vmem:[%s2986_s8 + $0x170] sm:$0xff] %v274_v38  ;;  %v278_v40 = vld [vmem:[%s2990_s9 + $0xc44] sm:$0xff]  ;;  %v280_v41 = vld [vmem:[%s2990_s9 + $0xc4c] sm:$0xff]  ;;  %277 = vst [vmem:[%s2986_s8 + $0x178] sm:$0xff] %v276_v39 }
  0x42   : >> { %279 = vst [vmem:[%s2986_s8 + $0x190] sm:$0xff] %v278_v40  ;;  %281 = vst [vmem:[%s2986_s8 + $0x198] sm:$0xff] %v280_v41  ;;  %v284_v43 = vld [vmem:[%s2990_s9 + $0xc5c] sm:$0xff]  ;;  %v286_v44 = vld [vmem:[%s2990_s9 + $0xc64] sm:$0xff] }
  0x43   : >> { %283 = vst [vmem:[%s2986_s8 + $0x1a0] sm:$0xff] %v282_v42  ;;  %285 = vst [vmem:[%s2986_s8 + $0x1a8] sm:$0xff] %v284_v43  ;;  %v288_v45 = vld [vmem:[%s2990_s9 + $0xc6c] sm:$0xff]  ;;  %v290_v46 = vld [vmem:[%s2990_s9 + $0xc74] sm:$0xff] }
  0x44   : >> { %287 = vst [vmem:[%s2986_s8 + $0x1b0] sm:$0xff] %v286_v44  ;;  %v292_v47 = vld [vmem:[%s2990_s9 + $0xc7c] sm:$0xff]  ;;  %289 = vst [vmem:[%s2986_s8 + $0x1b8] sm:$0xff] %v288_v45  ;;  %v298_v50 = vld [vmem:[%s2990_s9 + $0xec8] sm:$0xff] }
  0x45   : >> { %291 = vst [vmem:[%s2986_s8 + $0x1c0] sm:$0xff] %v290_v46  ;;  %293 = vst [vmem:[%s2986_s8 + $0x1c8] sm:$0xff] %v292_v47  ;;  %v294_v48 = vld [vmem:[%s2990_s9 + $0xeb8] sm:$0xff]  ;;  %v296_v49 = vld [vmem:[%s2990_s9 + $0xec0] sm:$0xff] }
  0x46   : >> { %295 = vst [vmem:[%s2986_s8 + $0x1e0] sm:$0xff] %v294_v48  ;;  %297 = vst [vmem:[%s2986_s8 + $0x1e8] sm:$0xff] %v296_v49  ;;  %v300_v51 = vld [vmem:[%s2990_s9 + $0xed0] sm:$0xff]  ;;  %v302_v52 = vld [vmem:[%s2990_s9 + $0xed8] sm:$0xff] }
  0x47   : >> { %299 = vst [vmem:[%s2986_s8 + $0x1f0] sm:$0xff] %v298_v50  ;;  %v304_v53 = vld [vmem:[%s2990_s9 + $0xee0] sm:$0xff]  ;;  %301 = vst [vmem:[%s2986_s8 + $0x1f8] sm:$0xff] %v300_v51  ;;  %v306_v54 = vld [vmem:[%s2990_s9 + $0xee8] sm:$0xff] }
  0x48   : >> { %303 = vst [vmem:[%s2986_s8 + $0x200] sm:$0xff] %v302_v52  ;;  %305 = vst [vmem:[%s2986_s8 + $0x208] sm:$0xff] %v304_v53  ;;  %v308_v55 = vld [vmem:[%s2990_s9 + $0xef0] sm:$0xff]  ;;  %v314_v58 = vld [vmem:[%s2990_s9 + $0x113c] sm:$0xff] }
  0x49   : >> { %v310_v56 = vld [vmem:[%s2990_s9 + $0x112c] sm:$0xff]  ;;  %307 = vst [vmem:[%s2986_s8 + $0x210] sm:$0xff] %v306_v54  ;;  %309 = vst [vmem:[%s2986_s8 + $0x218] sm:$0xff] %v308_v55  ;;  %v312_v57 = vld [vmem:[%s2990_s9 + $0x1134] sm:$0xff]  ;;  %194 = sbr.rel (!%p191_p0) target bundleno = 45 (0x2d), region = 235 }
  0x4a   : >> { %311 = vst [vmem:[%s2986_s8 + $0x230] sm:$0xff] %v310_v56  ;;  %v316_v59 = vld [vmem:[%s2990_s9 + $0x1144] sm:$0xff]  ;;  %313 = vst [vmem:[%s2986_s8 + $0x238] sm:$0xff] %v312_v57  ;;  %v318_v60 = vld [vmem:[%s2990_s9 + $0x114c] sm:$0xff] }
  0x4b   : >> { %315 = vst [vmem:[%s2986_s8 + $0x240] sm:$0xff] %v314_v58  ;;  %317 = vst [vmem:[%s2986_s8 + $0x248] sm:$0xff] %v316_v59  ;;  %v320_v61 = vld [vmem:[%s2990_s9 + $0x1154] sm:$0xff]  ;;  %v322_v62 = vld [vmem:[%s2990_s9 + $0x115c] sm:$0xff] }
  0x4c   : >> { %319 = vst [vmem:[%s2986_s8 + $0x250] sm:$0xff] %v318_v60  ;;  %321 = vst [vmem:[%s2986_s8 + $0x258] sm:$0xff] %v320_v61  ;;  %v324_v63 = vld [vmem:[%s2990_s9 + $0x1164] sm:$0xff]  ;;  %s4268_s9 = smov %s3261_s21 }
  0x4d   : >> { %323 = vst [vmem:[%s2986_s8 + $0x260] sm:$0xff] %v322_v62  ;;  %325 = vst [vmem:[%s2986_s8 + $0x268] sm:$0xff] %v324_v63  ;;  %s4267_s8 = smov %s3264_s22 }
  0x4e PF: > { %s3370_s23 = sand.u32 7, %s185_s6   ;;  %s2374_s24 = sshll.u32 %s3194_s7, 10 }
  0x4f   : > { %s337_s25 = sshra.s32 %s2374_s24, 4  ;;  %p2238_p1 = scmp.le.s32.totalorder %s3370_s23, 0 }
  0x50   : > { %s3374_s26 = scalar_lea.vmem %s3179_s28, %s337_s25   ;;  %s3377_s27 = scalar_lea.vmem %s3183_s4, %s337_s25 [#allocation2]  }
  0x51   : > { %2109 = sbr.rel (%p2238_p1) target bundleno = 94 (0x5e), region = 240  ;;  %s4270_s29 = smov (!%p2238_p1), %s3377_s27 }
  0x52   : > { %s4271_s8 = smov (!%p2238_p1), %s3374_s26  ;;  %s3386_s9 = smov (!%p2238_p1), 0  }
  0x53   : > { %s3388_s10 = smov (!%p2238_p1), 0  }
  0x56 LB: >> { %v353_v0 = vld [vmem:[%s3006_s8] sm:$0xff]  ;;  %v355_v1 = vld [vmem:[%s3006_s8 + $0x274] sm:$0xff]  ;;  %v357_v2 = vld [vmem:[%s3006_s8 + $0x4e8] sm:$0xff]  ;;  %s369_s6 = sadd.s32 1, %s3010_s9  ;;  %s347_s10 = sadd.s32 1, %s3014_s10   ;;  %s3014_s10 = sphi %s3388_s10, %s347_s10   ;;  %s3010_s9 = sphi %s3386_s9, %s4272_s9   ;;  %s3006_s8 = sphi %s4271_s8, %s374_s8   ;;  %s3002_s29 = sphi %s4270_s29, %s375_s29  }
  0x57   : >> { %354 = vst [vmem:[%s3002_s29] sm:$0xff] %v353_v0  ;;  %356 = vst [vmem:[%s3002_s29 + $0x50] sm:$0xff] %v355_v1  ;;  %v359_v3 = vld [vmem:[%s3006_s8 + $0x75c] sm:$0xff]  ;;  %v361_v4 = vld [vmem:[%s3006_s8 + $0x9d0] sm:$0xff]  ;;  %p370_p2 = scmp.ge.s32.totalorder %s369_s6, %s3370_s23  ;;  %p346_p3 = scmp.ge.s32.totalorder %s347_s10, %s3370_s23 }
  0x58   : >> { %358 = vst [vmem:[%s3002_s29 + $0xa0] sm:$0xff] %v357_v2  ;;  %v363_v5 = vld [vmem:[%s3006_s8 + $0xc44] sm:$0xff]  ;;  %360 = vst [vmem:[%s3002_s29 + $0xf0] sm:$0xff] %v359_v3  ;;  %v365_v6 = vld [vmem:[%s3006_s8 + $0xeb8] sm:$0xff] }
  0x59   : >> { %362 = vst [vmem:[%s3002_s29 + $0x140] sm:$0xff] %v361_v4  ;;  %364 = vst [vmem:[%s3002_s29 + $0x190] sm:$0xff] %v363_v5  ;;  %v367_v7 = vld [vmem:[%s3006_s8 + $0x112c] sm:$0xff]  ;;  %s4299_s6 = smov (%p370_p2, %s369_s6), 0  ;;  %349 = sbr.rel (!%p346_p3) target bundleno = 86 (0x56), region = 246 }
  0x5a   : >> { %366 = vst [vmem:[%s3002_s29 + $0x1e0] sm:$0xff] %v365_v6  ;;  %368 = vst [vmem:[%s3002_s29 + $0x230] sm:$0xff] %v367_v7  ;;  %s2239_s7 = sshll.u32 %s4299_s6, 3  ;;  %s4272_s9 = smov %s4299_s6 }
  0x5b   : >> { %s374_s8 = scalar_lea.vmem %s3374_s26, %s2239_s7   ;;  %s375_s29 = scalar_lea.vmem %s3377_s27, %s2239_s7 [#allocation2]  }
  0x5e PF: > { %378 = sbr.rel (%p181_p10) target bundleno = 164 (0xa4), region = 69  ;;  %s380_s11 = ssub.s32 (!%p181_p10), %s3181_s30, %s3187_s5 }
  0x5f   : > { %s384_s17 = sshrl.u32 (!%p181_p10), %s3181_s30, 3  ;;  %s3412_s18 = scalar_lea.vmem (!%p181_p10), %s3179_s28, %s380_s11 }
  0x60   : > { %s3415_s21 = scalar_lea.vmem (!%p181_p10), %s3183_s4, %s380_s11 [#allocation2]  ;;  %s3419_s22 = sshrl.u32 (!%p181_p10), %s384_s17, 3 }
  0x61   : > { %p2241_p4 = scmp.le.s32.totalorder (!%p181_p10), %s3419_s22, 0 }
  0x63   : > { %2123 = sbr.rel (%p2241_p4) target bundleno = 137 (0x89), region = 251  ;;  %s4273_s23 = smov (!%p2241_p4), %s3183_s4 }
  0x64   : > { %s4274_s24 = smov (!%p2241_p4), %s3179_s28  ;;  %s3428_s25 = smov (!%p2241_p4), 0  }
  0x65   : > { %s3430_s26 = smov (!%p2241_p4), 0  }
  0x68 LB: >> { %v397_v8 = vld [vmem:[%s3022_s24] sm:$0xff]  ;;  %v399_v9 = vld [vmem:[%s3022_s24 + $0x8] sm:$0xff]  ;;  %v401_v10 = vld [vmem:[%s3022_s24 + $0x10] sm:$0xff]  ;;  %s525_s27 = sadd.s32 1, %s3026_s25  ;;  %s391_s26 = sadd.s32 1, %s3030_s26   ;;  %s3030_s26 = sphi %s3430_s26, %s391_s26   ;;  %s3026_s25 = sphi %s3428_s25, %s4277_s25   ;;  %s3022_s24 = sphi %s4274_s24, %s4276_s24   ;;  %s3018_s23 = sphi %s4273_s23, %s4275_s23  }
  0x69   : >> { %398 = vst [vmem:[%s3018_s23] sm:$0xff] %v397_v8  ;;  %400 = vst [vmem:[%s3018_s23 + $0x8] sm:$0xff] %v399_v9  ;;  %v403_v11 = vld [vmem:[%s3022_s24 + $0x18] sm:$0xff]  ;;  %v405_v12 = vld [vmem:[%s3022_s24 + $0x20] sm:$0xff]  ;;  %p526_p6 = scmp.ge.s32.totalorder %s525_s27, %s3419_s22  ;;  %p390_p7 = scmp.ge.s32.totalorder %s391_s26, %s3419_s22 }
  0x6a   : >> { %402 = vst [vmem:[%s3018_s23 + $0x10] sm:$0xff] %v401_v10  ;;  %v407_v13 = vld [vmem:[%s3022_s24 + $0x28] sm:$0xff]  ;;  %404 = vst [vmem:[%s3018_s23 + $0x18] sm:$0xff] %v403_v11  ;;  %v409_v14 = vld [vmem:[%s3022_s24 + $0x30] sm:$0xff] }
  0x6b   : >> { %406 = vst [vmem:[%s3018_s23 + $0x20] sm:$0xff] %v405_v12  ;;  %408 = vst [vmem:[%s3018_s23 + $0x28] sm:$0xff] %v407_v13  ;;  %v411_v15 = vld [vmem:[%s3022_s24 + $0x38] sm:$0xff]  ;;  %v417_v18 = vld [vmem:[%s3022_s24 + $0x284] sm:$0xff]  ;;  %s4301_s27 = smov (%p526_p6, %s525_s27), 0 }
  0x6c   : >> { %v413_v16 = vld [vmem:[%s3022_s24 + $0x274] sm:$0xff]  ;;  %410 = vst [vmem:[%s3018_s23 + $0x30] sm:$0xff] %v409_v14  ;;  %412 = vst [vmem:[%s3018_s23 + $0x38] sm:$0xff] %v411_v15  ;;  %v415_v17 = vld [vmem:[%s3022_s24 + $0x27c] sm:$0xff]  ;;  %s2242_s29 = sshll.u32 %s4301_s27, 6  ;;  %s4277_s25 = smov %s4301_s27 }
  0x6d   : >> { %414 = vst [vmem:[%s3018_s23 + $0x50] sm:$0xff] %v413_v16  ;;  %v419_v19 = vld [vmem:[%s3022_s24 + $0x28c] sm:$0xff]  ;;  %416 = vst [vmem:[%s3018_s23 + $0x58] sm:$0xff] %v415_v17  ;;  %v421_v20 = vld [vmem:[%s3022_s24 + $0x294] sm:$0xff]  ;;  %s3486_s8 = scalar_lea.vmem %s3179_s28, %s2242_s29   ;;  %s3489_s9 = scalar_lea.vmem %s3183_s4, %s2242_s29 [#allocation2]  }
  0x6e   : >> { %418 = vst [vmem:[%s3018_s23 + $0x60] sm:$0xff] %v417_v18  ;;  %420 = vst [vmem:[%s3018_s23 + $0x68] sm:$0xff] %v419_v19  ;;  %v423_v21 = vld [vmem:[%s3022_s24 + $0x29c] sm:$0xff]  ;;  %v425_v22 = vld [vmem:[%s3022_s24 + $0x2a4] sm:$0xff] }
  0x6f   : >> { %422 = vst [vmem:[%s3018_s23 + $0x70] sm:$0xff] %v421_v20  ;;  %424 = vst [vmem:[%s3018_s23 + $0x78] sm:$0xff] %v423_v21  ;;  %v427_v23 = vld [vmem:[%s3022_s24 + $0x2ac] sm:$0xff]  ;;  %v433_v26 = vld [vmem:[%s3022_s24 + $0x4f8] sm:$0xff] }
  0x70   : >> { %426 = vst [vmem:[%s3018_s23 + $0x80] sm:$0xff] %v425_v22  ;;  %v429_v24 = vld [vmem:[%s3022_s24 + $0x4e8] sm:$0xff]  ;;  %v431_v25 = vld [vmem:[%s3022_s24 + $0x4f0] sm:$0xff]  ;;  %428 = vst [vmem:[%s3018_s23 + $0x88] sm:$0xff] %v427_v23 }
  0x71   : >> { %430 = vst [vmem:[%s3018_s23 + $0xa0] sm:$0xff] %v429_v24  ;;  %432 = vst [vmem:[%s3018_s23 + $0xa8] sm:$0xff] %v431_v25  ;;  %v435_v27 = vld [vmem:[%s3022_s24 + $0x500] sm:$0xff]  ;;  %v437_v28 = vld [vmem:[%s3022_s24 + $0x508] sm:$0xff] }
  0x72   : >> { %434 = vst [vmem:[%s3018_s23 + $0xb0] sm:$0xff] %v433_v26  ;;  %436 = vst [vmem:[%s3018_s23 + $0xb8] sm:$0xff] %v435_v27  ;;  %v439_v29 = vld [vmem:[%s3022_s24 + $0x510] sm:$0xff]  ;;  %v441_v30 = vld [vmem:[%s3022_s24 + $0x518] sm:$0xff] }
  0x73   : >> { %438 = vst [vmem:[%s3018_s23 + $0xc0] sm:$0xff] %v437_v28  ;;  %v443_v31 = vld [vmem:[%s3022_s24 + $0x520] sm:$0xff]  ;;  %440 = vst [vmem:[%s3018_s23 + $0xc8] sm:$0xff] %v439_v29  ;;  %v449_v34 = vld [vmem:[%s3022_s24 + $0x76c] sm:$0xff] }
  0x74   : >> { %442 = vst [vmem:[%s3018_s23 + $0xd0] sm:$0xff] %v441_v30  ;;  %444 = vst [vmem:[%s3018_s23 + $0xd8] sm:$0xff] %v443_v31  ;;  %v445_v32 = vld [vmem:[%s3022_s24 + $0x75c] sm:$0xff]  ;;  %v447_v33 = vld [vmem:[%s3022_s24 + $0x764] sm:$0xff] }
  0x75   : >> { %446 = vst [vmem:[%s3018_s23 + $0xf0] sm:$0xff] %v445_v32  ;;  %448 = vst [vmem:[%s3018_s23 + $0xf8] sm:$0xff] %v447_v33  ;;  %v451_v35 = vld [vmem:[%s3022_s24 + $0x774] sm:$0xff]  ;;  %v453_v36 = vld [vmem:[%s3022_s24 + $0x77c] sm:$0xff] }
  0x76   : >> { %450 = vst [vmem:[%s3018_s23 + $0x100] sm:$0xff] %v449_v34  ;;  %v455_v37 = vld [vmem:[%s3022_s24 + $0x784] sm:$0xff]  ;;  %452 = vst [vmem:[%s3018_s23 + $0x108] sm:$0xff] %v451_v35  ;;  %v457_v38 = vld [vmem:[%s3022_s24 + $0x78c] sm:$0xff] }
  0x77   : >> { %454 = vst [vmem:[%s3018_s23 + $0x110] sm:$0xff] %v453_v36  ;;  %456 = vst [vmem:[%s3018_s23 + $0x118] sm:$0xff] %v455_v37  ;;  %v459_v39 = vld [vmem:[%s3022_s24 + $0x794] sm:$0xff]  ;;  %v465_v42 = vld [vmem:[%s3022_s24 + $0x9e0] sm:$0xff] }
  0x78   : >> { %v461_v40 = vld [vmem:[%s3022_s24 + $0x9d0] sm:$0xff]  ;;  %458 = vst [vmem:[%s3018_s23 + $0x120] sm:$0xff] %v457_v38  ;;  %460 = vst [vmem:[%s3018_s23 + $0x128] sm:$0xff] %v459_v39  ;;  %v463_v41 = vld [vmem:[%s3022_s24 + $0x9d8] sm:$0xff] }
  0x79   : >> { %462 = vst [vmem:[%s3018_s23 + $0x140] sm:$0xff] %v461_v40  ;;  %v467_v43 = vld [vmem:[%s3022_s24 + $0x9e8] sm:$0xff]  ;;  %464 = vst [vmem:[%s3018_s23 + $0x148] sm:$0xff] %v463_v41  ;;  %v469_v44 = vld [vmem:[%s3022_s24 + $0x9f0] sm:$0xff] }
  0x7a   : >> { %466 = vst [vmem:[%s3018_s23 + $0x150] sm:$0xff] %v465_v42  ;;  %468 = vst [vmem:[%s3018_s23 + $0x158] sm:$0xff] %v467_v43  ;;  %v471_v45 = vld [vmem:[%s3022_s24 + $0x9f8] sm:$0xff]  ;;  %v473_v46 = vld [vmem:[%s3022_s24 + $0xa00] sm:$0xff] }
  0x7b   : >> { %470 = vst [vmem:[%s3018_s23 + $0x160] sm:$0xff] %v469_v44  ;;  %472 = vst [vmem:[%s3018_s23 + $0x168] sm:$0xff] %v471_v45  ;;  %v475_v47 = vld [vmem:[%s3022_s24 + $0xa08] sm:$0xff]  ;;  %v481_v50 = vld [vmem:[%s3022_s24 + $0xc54] sm:$0xff] }
  0x7c   : >> { %474 = vst [vmem:[%s3018_s23 + $0x170] sm:$0xff] %v473_v46  ;;  %v477_v48 = vld [vmem:[%s3022_s24 + $0xc44] sm:$0xff]  ;;  %v479_v49 = vld [vmem:[%s3022_s24 + $0xc4c] sm:$0xff]  ;;  %476 = vst [vmem:[%s3018_s23 + $0x178] sm:$0xff] %v475_v47 }
  0x7d   : >> { %478 = vst [vmem:[%s3018_s23 + $0x190] sm:$0xff] %v477_v48  ;;  %480 = vst [vmem:[%s3018_s23 + $0x198] sm:$0xff] %v479_v49  ;;  %v483_v51 = vld [vmem:[%s3022_s24 + $0xc5c] sm:$0xff]  ;;  %v485_v52 = vld [vmem:[%s3022_s24 + $0xc64] sm:$0xff] }
  0x7e   : >> { %482 = vst [vmem:[%s3018_s23 + $0x1a0] sm:$0xff] %v481_v50  ;;  %484 = vst [vmem:[%s3018_s23 + $0x1a8] sm:$0xff] %v483_v51  ;;  %v487_v53 = vld [vmem:[%s3022_s24 + $0xc6c] sm:$0xff]  ;;  %v489_v54 = vld [vmem:[%s3022_s24 + $0xc74] sm:$0xff] }
  0x7f   : >> { %486 = vst [vmem:[%s3018_s23 + $0x1b0] sm:$0xff] %v485_v52  ;;  %v491_v55 = vld [vmem:[%s3022_s24 + $0xc7c] sm:$0xff]  ;;  %488 = vst [vmem:[%s3018_s23 + $0x1b8] sm:$0xff] %v487_v53  ;;  %v497_v58 = vld [vmem:[%s3022_s24 + $0xec8] sm:$0xff] }
  0x80   : >> { %490 = vst [vmem:[%s3018_s23 + $0x1c0] sm:$0xff] %v489_v54  ;;  %492 = vst [vmem:[%s3018_s23 + $0x1c8] sm:$0xff] %v491_v55  ;;  %v493_v56 = vld [vmem:[%s3022_s24 + $0xeb8] sm:$0xff]  ;;  %v495_v57 = vld [vmem:[%s3022_s24 + $0xec0] sm:$0xff] }
  0x81   : >> { %494 = vst [vmem:[%s3018_s23 + $0x1e0] sm:$0xff] %v493_v56  ;;  %496 = vst [vmem:[%s3018_s23 + $0x1e8] sm:$0xff] %v495_v57  ;;  %v499_v59 = vld [vmem:[%s3022_s24 + $0xed0] sm:$0xff]  ;;  %v501_v60 = vld [vmem:[%s3022_s24 + $0xed8] sm:$0xff] }
  0x82   : >> { %498 = vst [vmem:[%s3018_s23 + $0x1f0] sm:$0xff] %v497_v58  ;;  %v503_v61 = vld [vmem:[%s3022_s24 + $0xee0] sm:$0xff]  ;;  %500 = vst [vmem:[%s3018_s23 + $0x1f8] sm:$0xff] %v499_v59  ;;  %v505_v62 = vld [vmem:[%s3022_s24 + $0xee8] sm:$0xff] }
  0x83   : >> { %502 = vst [vmem:[%s3018_s23 + $0x200] sm:$0xff] %v501_v60  ;;  %504 = vst [vmem:[%s3018_s23 + $0x208] sm:$0xff] %v503_v61  ;;  %v507_v63 = vld [vmem:[%s3022_s24 + $0xef0] sm:$0xff]  ;;  %v513_v2 = vld [vmem:[%s3022_s24 + $0x113c] sm:$0xff] }
  0x84   : >> { %v509_v0 = vld [vmem:[%s3022_s24 + $0x112c] sm:$0xff]  ;;  %506 = vst [vmem:[%s3018_s23 + $0x210] sm:$0xff] %v505_v62  ;;  %508 = vst [vmem:[%s3018_s23 + $0x218] sm:$0xff] %v507_v63  ;;  %v511_v1 = vld [vmem:[%s3022_s24 + $0x1134] sm:$0xff]  ;;  %393 = sbr.rel (!%p390_p7) target bundleno = 104 (0x68), region = 257 }
  0x85   : >> { %510 = vst [vmem:[%s3018_s23 + $0x230] sm:$0xff] %v509_v0  ;;  %v515_v3 = vld [vmem:[%s3022_s24 + $0x1144] sm:$0xff]  ;;  %512 = vst [vmem:[%s3018_s23 + $0x238] sm:$0xff] %v511_v1  ;;  %v517_v4 = vld [vmem:[%s3022_s24 + $0x114c] sm:$0xff] }
  0x86   : >> { %514 = vst [vmem:[%s3018_s23 + $0x240] sm:$0xff] %v513_v2  ;;  %516 = vst [vmem:[%s3018_s23 + $0x248] sm:$0xff] %v515_v3  ;;  %v519_v5 = vld [vmem:[%s3022_s24 + $0x1154] sm:$0xff]  ;;  %v521_v6 = vld [vmem:[%s3022_s24 + $0x115c] sm:$0xff] }
  0x87   : >> { %518 = vst [vmem:[%s3018_s23 + $0x250] sm:$0xff] %v517_v4  ;;  %520 = vst [vmem:[%s3018_s23 + $0x258] sm:$0xff] %v519_v5  ;;  %v523_v7 = vld [vmem:[%s3022_s24 + $0x1164] sm:$0xff]  ;;  %s4276_s24 = smov %s3486_s8 }
  0x88   : >> { %522 = vst [vmem:[%s3018_s23 + $0x260] sm:$0xff] %v521_v6  ;;  %524 = vst [vmem:[%s3018_s23 + $0x268] sm:$0xff] %v523_v7  ;;  %s4275_s23 = smov %s3489_s9 }
  0x89 PF: > { %s3595_s10 = sand.u32 7, %s384_s17   ;;  %s2376_s6 = sshll.u32 %s3419_s22, 10 }
  0x8a   : > { %s536_s7 = sshra.s32 %s2376_s6, 4  ;;  %p2247_p8 = scmp.le.s32.totalorder %s3595_s10, 0 }
  0x8b   : > { %s3599_s11 = scalar_lea.vmem %s3179_s28, %s536_s7   ;;  %s3602_s29 = scalar_lea.vmem %s3183_s4, %s536_s7 [#allocation2]  }
  0x8c   : > { %2137 = sbr.rel (%p2247_p8) target bundleno = 153 (0x99), region = 262  ;;  %s4278_s23 = smov (!%p2247_p8), %s3602_s29 }
  0x8d   : > { %s4279_s24 = smov (!%p2247_p8), %s3599_s11  ;;  %s3611_s25 = smov (!%p2247_p8), 0  }
  0x8e   : > { %s3613_s26 = smov (!%p2247_p8), 0  }
  0x91 LB: >> { %v552_v8 = vld [vmem:[%s3038_s24] sm:$0xff]  ;;  %v554_v9 = vld [vmem:[%s3038_s24 + $0x274] sm:$0xff]  ;;  %v556_v10 = vld [vmem:[%s3038_s24 + $0x4e8] sm:$0xff]  ;;  %s568_s17 = sadd.s32 1, %s3042_s25  ;;  %s546_s26 = sadd.s32 1, %s3046_s26   ;;  %s3046_s26 = sphi %s3613_s26, %s546_s26   ;;  %s3042_s25 = sphi %s3611_s25, %s4280_s25   ;;  %s3038_s24 = sphi %s4279_s24, %s573_s24   ;;  %s3034_s23 = sphi %s4278_s23, %s574_s23  }
  0x92   : >> { %553 = vst [vmem:[%s3034_s23] sm:$0xff] %v552_v8  ;;  %555 = vst [vmem:[%s3034_s23 + $0x50] sm:$0xff] %v554_v9  ;;  %v558_v11 = vld [vmem:[%s3038_s24 + $0x75c] sm:$0xff]  ;;  %v560_v12 = vld [vmem:[%s3038_s24 + $0x9d0] sm:$0xff]  ;;  %p569_p9 = scmp.ge.s32.totalorder %s568_s17, %s3595_s10  ;;  %p545_p10 = scmp.ge.s32.totalorder %s546_s26, %s3595_s10 }
  0x93   : >> { %557 = vst [vmem:[%s3034_s23 + $0xa0] sm:$0xff] %v556_v10  ;;  %v562_v13 = vld [vmem:[%s3038_s24 + $0xc44] sm:$0xff]  ;;  %559 = vst [vmem:[%s3034_s23 + $0xf0] sm:$0xff] %v558_v11  ;;  %v564_v14 = vld [vmem:[%s3038_s24 + $0xeb8] sm:$0xff] }
  0x94   : >> { %561 = vst [vmem:[%s3034_s23 + $0x140] sm:$0xff] %v560_v12  ;;  %563 = vst [vmem:[%s3034_s23 + $0x190] sm:$0xff] %v562_v13  ;;  %v566_v15 = vld [vmem:[%s3038_s24 + $0x112c] sm:$0xff]  ;;  %s4303_s17 = smov (%p569_p9, %s568_s17), 0  ;;  %548 = sbr.rel (!%p545_p10) target bundleno = 145 (0x91), region = 268 }
  0x95   : >> { %565 = vst [vmem:[%s3034_s23 + $0x1e0] sm:$0xff] %v564_v14  ;;  %567 = vst [vmem:[%s3034_s23 + $0x230] sm:$0xff] %v566_v15  ;;  %s2248_s22 = sshll.u32 %s4303_s17, 3  ;;  %s4280_s25 = smov %s4303_s17 }
  0x96   : >> { %s573_s24 = scalar_lea.vmem %s3599_s11, %s2248_s22   ;;  %s574_s23 = scalar_lea.vmem %s3602_s29, %s2248_s22 [#allocation2]  }
  0x99 PF: > { %s3112_s27 = smov 1  }
  0x9a   : > { %s575_s8 = sshll.u32 %s3112_s27, %s3187_s5 }
  0x9b   : > { %s2250_s9 = sadd.s32 4294967295, %s575_s8 }
  0x9c   : > { %v585_v16 = vld [vmem:[%s3412_s18] sm:%s2250_s9]  ;;  %v587_v17 = vld [vmem:[%s3412_s18 + $0x274] sm:%s2250_s9] }
  0x9d   : > { %586 = vst [vmem:[%s3415_s21] sm:%s2250_s9] %v585_v16  ;;  %588 = vst [vmem:[%s3415_s21 + $0x50] sm:%s2250_s9] %v587_v17 }
  0x9e   : > { %v589_v18 = vld [vmem:[%s3412_s18 + $0x4e8] sm:%s2250_s9]  ;;  %v591_v19 = vld [vmem:[%s3412_s18 + $0x75c] sm:%s2250_s9] }
  0x9f   : > { %590 = vst [vmem:[%s3415_s21 + $0xa0] sm:%s2250_s9] %v589_v18  ;;  %592 = vst [vmem:[%s3415_s21 + $0xf0] sm:%s2250_s9] %v591_v19 }
  0xa0   : > { %v593_v20 = vld [vmem:[%s3412_s18 + $0x9d0] sm:%s2250_s9]  ;;  %v595_v21 = vld [vmem:[%s3412_s18 + $0xc44] sm:%s2250_s9] }
  0xa1   : > { %594 = vst [vmem:[%s3415_s21 + $0x140] sm:%s2250_s9] %v593_v20  ;;  %596 = vst [vmem:[%s3415_s21 + $0x190] sm:%s2250_s9] %v595_v21 }
  0xa2   : > { %v597_v22 = vld [vmem:[%s3412_s18 + $0xeb8] sm:%s2250_s9]  ;;  %v599_v23 = vld [vmem:[%s3412_s18 + $0x112c] sm:%s2250_s9] }
  0xa3   : > { %598 = vst [vmem:[%s3415_s21 + $0x1e0] sm:%s2250_s9] %v597_v22  ;;  %600 = vst [vmem:[%s3415_s21 + $0x230] sm:%s2250_s9] %v599_v23 }
  0xa4 PF: > { %p2251_p11 = scmp.ge.u32.totalorder %s3181_s30, 8 }
  0xa5   : > { %s3113_s5 = smov (!%p2251_p11), 1  }
  0xa6   : > { %153 = sbr.rel (%p2251_p11) target bundleno = 179 (0xb3), region = 40  ;;  %s154_s18 = sshll.u32 (!%p2251_p11), %s3113_s5, %s3181_s30 }
  0xa7   : > { %s2252_s21 = sadd.s32 (!%p2251_p11), 4294967295, %s154_s18 }
  0xab   : > { %v164_v24 = vld [vmem:[%s3179_s28] sm:%s2252_s21]  ;;  %v166_v25 = vld [vmem:[%s3179_s28 + $0x274] sm:%s2252_s21] }
  0xac   : > { %165 = vst [vmem:[%s3183_s4] sm:%s2252_s21] %v164_v24  ;;  %167 = vst [vmem:[%s3183_s4 + $0x50] sm:%s2252_s21] %v166_v25 }
  0xad   : > { %v168_v26 = vld [vmem:[%s3179_s28 + $0x4e8] sm:%s2252_s21]  ;;  %v170_v27 = vld [vmem:[%s3179_s28 + $0x75c] sm:%s2252_s21] }
  0xae   : > { %169 = vst [vmem:[%s3183_s4 + $0xa0] sm:%s2252_s21] %v168_v26  ;;  %171 = vst [vmem:[%s3183_s4 + $0xf0] sm:%s2252_s21] %v170_v27 }
  0xaf   : > { %v172_v28 = vld [vmem:[%s3179_s28 + $0x9d0] sm:%s2252_s21]  ;;  %v174_v29 = vld [vmem:[%s3179_s28 + $0xc44] sm:%s2252_s21] }
  0xb0   : > { %173 = vst [vmem:[%s3183_s4 + $0x140] sm:%s2252_s21] %v172_v28  ;;  %175 = vst [vmem:[%s3183_s4 + $0x190] sm:%s2252_s21] %v174_v29 }
  0xb1   : > { %v176_v30 = vld [vmem:[%s3179_s28 + $0xeb8] sm:%s2252_s21]  ;;  %v178_v31 = vld [vmem:[%s3179_s28 + $0x112c] sm:%s2252_s21] }
  0xb2   : > { %177 = vst [vmem:[%s3183_s4 + $0x1e0] sm:%s2252_s21] %v176_v30  ;;  %179 = vst [vmem:[%s3183_s4 + $0x230] sm:%s2252_s21] %v178_v31 }
  0xb3 PF: > { %p2253_p12 = scmp.ge.s32.totalorder %s2982_s14, 1  ;;  %p603_p13 = scmp.lt.s32.totalorder %s2982_s14, 9 }
  0xb5   : > { %p604_p0 = pnand %p2253_p12, %p603_p13 }
  0xb6   : > { %s610_s30 = sand.u32 (!%p604_p0), 1, %s2974_s12  }
  0xb7   : > { %607 = sbr.rel (%p604_p0) target bundleno = 630 (0x276), region = 94 }
  0xb8   : > { %s2384_s28 = smul.u32 (!%p604_p0), 640, %s610_s30 }
  0xb9   : > { %s2385_s11 = smul.u32 (!%p604_p0), 160, %s610_s30 }
  0xba   : > { %s3677_s14 = scalar_lea.vmem (!%p604_p0), [#allocation2], %s2384_s28 }
  0xbb   : > { %s3800_s29 = scalar_lea.vmem (!%p604_p0), [#allocation3], %s2385_s11  }
  0xbc   : > { %v724_v32 = vld [vmem:[%s4262_s2] sm:$0xff]  ;;  %v3114_v33 = vmov 0   ;;  %v2674_v35 = vld [vmem:[%s3677_s14 + $0x1ec] ss:$80 sps:$4 sm:$0xff]   ;;  %v2677_v37 = vld [vmem:[%s3677_s14 + $0x1e8] ss:$80 sps:$4 sm:$0xff]  }
  0xbd   : > { %1166 = vmatprep.mubr.bf16.mxu0 %v3114_v33  ;;  %1207 = vmatprep.mubr.bf16.mxu1 %v3114_v33  ;;  %v2672_v34 = vld [vmem:[%s3677_s14 + $0x1e4] ss:$80 sps:$4 sm:$0xff]   ;;  %v2676_v36 = vld [vmem:[%s3677_s14 + $0x1e0] ss:$80 sps:$4 sm:$0xff]   ;;  %v2680_v39 = vld [vmem:[%s3677_s14 + $0x14c] ss:$80 sps:$4 sm:$0xff]  }
  0xbe   : > { %2671 = vset.pattern.permute.xlu0 %v3114_v33  ;;  %1142 = vmatprep.subr.bf16.mxu0 %v2672_v34  ;;  %v2678_v38 = vld [vmem:[%s3677_s14 + $0x144] ss:$80 sps:$4 sm:$0xff]   ;;  %v2682_v40 = vld [vmem:[%s3677_s14 + $0x140] ss:$80 sps:$4 sm:$0xff]   ;;  %v2683_v41 = vld [vmem:[%s3677_s14 + $0x148] ss:$80 sps:$4 sm:$0xff]  }
  0xbf   : > { %727 = vperm.xlu0 %2671, %v724_v32   ;;  %1183 = vmatprep.subr.bf16.mxu1 %v2674_v35  ;;  %v2684_v42 = vld [vmem:[%s3677_s14 + $0xa4] ss:$80 sps:$4 sm:$0xff]   ;;  %v2686_v43 = vld [vmem:[%s3677_s14 + $0xac] ss:$80 sps:$4 sm:$0xff]   ;;  %v2688_v44 = vld [vmem:[%s3677_s14 + $0xa0] ss:$80 sps:$4 sm:$0xff]  }
  0xc0   : > { %1143 = vmatpush1.bf16.msra.mxu0 %v2676_v36  ;;  %1184 = vmatpush1.bf16.msra.mxu1 %v2677_v37  ;;  %v2689_v45 = vld [vmem:[%s3677_s14 + $0xa8] ss:$80 sps:$4 sm:$0xff]   ;;  %v2690_v46 = vld [vmem:[%s3677_s14 + $0x4] ss:$80 sps:$4 sm:$0xff]   ;;  %v2692_v47 = vld [vmem:[%s3677_s14 + $0xc] ss:$80 sps:$4 sm:$0xff]  }
  0xc1   : > { %1144 = vmatprep.subr.bf16.mxu0 %v2678_v38  ;;  %1185 = vmatprep.subr.bf16.mxu1 %v2680_v39  ;;  %v2694_v48 = vld [vmem:[%s3677_s14] ss:$80 sps:$4 sm:$0xff]   ;;  %v2695_v49 = vld [vmem:[%s3677_s14 + $0x8] ss:$80 sps:$4 sm:$0xff]   ;;  %v2698_v50 = vld [vmem:[%s3677_s14 + $0x1f4] ss:$80 sps:$4 sm:$0xff]  }
  0xc2   : > { %v2701_v51 = vld [vmem:[%s3677_s14 + $0x1fc] ss:$80 sps:$4 sm:$0xff]   ;;  %v3700_v52 = vld [vmem:[%s4260_s0] sm:$0xf]  ;;  %v2699_v54 = vld [vmem:[%s3677_s14 + $0x1f8] ss:$80 sps:$4 sm:$0xff]  }
  0xc3   : > { %v2696_v53 = vld [vmem:[%s3677_s14 + $0x1f0] ss:$80 sps:$4 sm:$0xff]   ;;  %vm1130_vm0 = vcmask 523264   ;;  %v2704_v55 = vld [vmem:[%s3677_s14 + $0x154] ss:$80 sps:$4 sm:$0xff]   ;;  %s1591_s12 = smul.u32 (%p3168_p5), 20, %s3153_s15 }
  0xc4   : > { %1145 = vmatpush1.bf16.msra.mxu0 %v2682_v40  ;;  %1186 = vmatpush1.bf16.msra.mxu1 %v2683_v41  ;;  %v2707_v56 = vld [vmem:[%s3677_s14 + $0x15c] ss:$80 sps:$4 sm:$0xff]   ;;  %v2702_v57 = vld [vmem:[%s3677_s14 + $0x150] ss:$80 sps:$4 sm:$0xff]   ;;  %v2705_v58 = vld [vmem:[%s3677_s14 + $0x158] ss:$80 sps:$4 sm:$0xff]  }
  0xc5   : > { %1146 = vmatprep.subr.bf16.mxu0 %v2684_v42  ;;  %1187 = vmatprep.subr.bf16.mxu1 %v2686_v43  ;;  %v2710_v59 = vld [vmem:[%s3677_s14 + $0xb4] ss:$80 sps:$4 sm:$0xff]   ;;  %v2713_v60 = vld [vmem:[%s3677_s14 + $0xbc] ss:$80 sps:$4 sm:$0xff]   ;;  %v2708_v61 = vld [vmem:[%s3677_s14 + $0xb0] ss:$80 sps:$4 sm:$0xff]  }
  0xc6   : > { %v2711_v62 = vld [vmem:[%s3677_s14 + $0xb8] ss:$80 sps:$4 sm:$0xff]   ;;  %v2716_v63 = vld [vmem:[%s3677_s14 + $0x14] ss:$80 sps:$4 sm:$0xff]   ;;  %v2719_v0 = vld [vmem:[%s3677_s14 + $0x1c] ss:$80 sps:$4 sm:$0xff]  }
  0xc7   : > { %v2714_v1 = vld [vmem:[%s3677_s14 + $0x10] ss:$80 sps:$4 sm:$0xff]   ;;  %v2717_v2 = vld [vmem:[%s3677_s14 + $0x18] ss:$80 sps:$4 sm:$0xff]   ;;  %v2722_v3 = vld [vmem:[%s3677_s14 + $0x204] ss:$80 sps:$4 sm:$0xff]  }
  0xc8   : > { %1147 = vmatpush1.bf16.msra.mxu0 %v2688_v44  ;;  %1188 = vmatpush1.bf16.msra.mxu1 %v2689_v45  ;;  %v2725_v4 = vld [vmem:[%s3677_s14 + $0x20c] ss:$80 sps:$4 sm:$0xff]   ;;  %v2720_v5 = vld [vmem:[%s3677_s14 + $0x200] ss:$80 sps:$4 sm:$0xff]   ;;  %v2723_v6 = vld [vmem:[%s3677_s14 + $0x208] ss:$80 sps:$4 sm:$0xff]  }
  0xc9   : > { %1148 = vmatprep.subr.bf16.mxu0 %v2690_v46  ;;  %1189 = vmatprep.subr.bf16.mxu1 %v2692_v47  ;;  %v2728_v7 = vld [vmem:[%s3677_s14 + $0x164] ss:$80 sps:$4 sm:$0xff]   ;;  %v2731_v8 = vld [vmem:[%s3677_s14 + $0x16c] ss:$80 sps:$4 sm:$0xff]   ;;  %v2726_v9 = vld [vmem:[%s3677_s14 + $0x160] ss:$80 sps:$4 sm:$0xff]  }
  0xca   : > { %v2729_v10 = vld [vmem:[%s3677_s14 + $0x168] ss:$80 sps:$4 sm:$0xff]   ;;  %v2734_v11 = vld [vmem:[%s3677_s14 + $0xc4] ss:$80 sps:$4 sm:$0xff]   ;;  %v2737_v12 = vld [vmem:[%s3677_s14 + $0xcc] ss:$80 sps:$4 sm:$0xff]  }
  0xcb   : > { %v2732_v13 = vld [vmem:[%s3677_s14 + $0xc0] ss:$80 sps:$4 sm:$0xff]   ;;  %v2735_v14 = vld [vmem:[%s3677_s14 + $0xc8] ss:$80 sps:$4 sm:$0xff]   ;;  %v2740_v15 = vld [vmem:[%s3677_s14 + $0x24] ss:$80 sps:$4 sm:$0xff]  }
  0xcc   : > { %1149 = vmatpush1.bf16.msra.mxu0 %v2694_v48  ;;  %1190 = vmatpush1.bf16.msra.mxu1 %v2695_v49  ;;  %v2743_v16 = vld [vmem:[%s3677_s14 + $0x2c] ss:$80 sps:$4 sm:$0xff]   ;;  %v2738_v17 = vld [vmem:[%s3677_s14 + $0x20] ss:$80 sps:$4 sm:$0xff]   ;;  %v2741_v18 = vld [vmem:[%s3677_s14 + $0x28] ss:$80 sps:$4 sm:$0xff]  }
  0xcd   : > { %1224 = vmatprep.subr.bf16.mxu0 %v2698_v50  ;;  %1265 = vmatprep.subr.bf16.mxu1 %v2701_v51  ;;  %v2746_v19 = vld [vmem:[%s3677_s14 + $0x214] ss:$80 sps:$4 sm:$0xff]   ;;  %v2749_v20 = vld [vmem:[%s3677_s14 + $0x21c] ss:$80 sps:$4 sm:$0xff]   ;;  %v2744_v21 = vld [vmem:[%s3677_s14 + $0x210] ss:$80 sps:$4 sm:$0xff]  }
  0xce   : > { %v2747_v22 = vld [vmem:[%s3677_s14 + $0x218] ss:$80 sps:$4 sm:$0xff]   ;;  %v2752_v23 = vld [vmem:[%s3677_s14 + $0x174] ss:$80 sps:$4 sm:$0xff]   ;;  %v2755_v24 = vld [vmem:[%s3677_s14 + $0x17c] ss:$80 sps:$4 sm:$0xff]  }
  0xcf   : > { %2334 = vmatmul.mubr.msk.bf16.vlgmr.msra.gmra.mxu0 %vm1130_vm0, %v3700_v52  ;;  %2335 = vmatmul.mubr.msk.bf16.vlgmr.msra.gmra.mxu1 %vm1130_vm0, %v3700_v52  ;;  %v2750_v25 = vld [vmem:[%s3677_s14 + $0x170] ss:$80 sps:$4 sm:$0xff]   ;;  %v2753_v26 = vld [vmem:[%s3677_s14 + $0x178] ss:$80 sps:$4 sm:$0xff]   ;;  %v2758_v27 = vld [vmem:[%s3677_s14 + $0xd4] ss:$80 sps:$4 sm:$0xff]  }
  0xd0   : > { %1225 = vmatpush1.bf16.msra.mxu0 %v2696_v53  ;;  %1266 = vmatpush1.bf16.msra.mxu1 %v2699_v54  ;;  %v2761_v28 = vld [vmem:[%s3677_s14 + $0xdc] ss:$80 sps:$4 sm:$0xff]   ;;  %v2756_v29 = vld [vmem:[%s3677_s14 + $0xd0] ss:$80 sps:$4 sm:$0xff]   ;;  %v2759_v30 = vld [vmem:[%s3677_s14 + $0xd8] ss:$80 sps:$4 sm:$0xff]  }
  0xd1   : > { %1226 = vmatprep.subr.bf16.mxu0 %v2704_v55  ;;  %1267 = vmatprep.subr.bf16.mxu1 %v2707_v56  ;;  %v2764_v31 = vld [vmem:[%s3677_s14 + $0x34] ss:$80 sps:$4 sm:$0xff]   ;;  %v2767_v32 = vld [vmem:[%s3677_s14 + $0x3c] ss:$80 sps:$4 sm:$0xff]   ;;  %v2762_v34 = vld [vmem:[%s3677_s14 + $0x30] ss:$80 sps:$4 sm:$0xff]  }
  0xd2   : > { %1248 = vmatprep.mubr.bf16.mxu0 %v3114_v33  ;;  %1289 = vmatprep.mubr.bf16.mxu1 %v3114_v33  ;;  %v2765_v35 = vld [vmem:[%s3677_s14 + $0x38] ss:$80 sps:$4 sm:$0xff]   ;;  %v2770_v36 = vld [vmem:[%s3677_s14 + $0x224] ss:$80 sps:$4 sm:$0xff]   ;;  %v2773_v37 = vld [vmem:[%s3677_s14 + $0x22c] ss:$80 sps:$4 sm:$0xff]  }
  0xd3   : > { %v2768_v38 = vld [vmem:[%s3677_s14 + $0x220] ss:$80 sps:$4 sm:$0xff]   ;;  %v2771_v39 = vld [vmem:[%s3677_s14 + $0x228] ss:$80 sps:$4 sm:$0xff]   ;;  %v2776_v40 = vld [vmem:[%s3677_s14 + $0x184] ss:$80 sps:$4 sm:$0xff]  }
  0xd4   : > { %1227 = vmatpush1.bf16.msra.mxu0 %v2702_v57  ;;  %1268 = vmatpush1.bf16.msra.mxu1 %v2705_v58  ;;  %v2779_v41 = vld [vmem:[%s3677_s14 + $0x18c] ss:$80 sps:$4 sm:$0xff]   ;;  %v2774_v42 = vld [vmem:[%s3677_s14 + $0x180] ss:$80 sps:$4 sm:$0xff]   ;;  %v2777_v43 = vld [vmem:[%s3677_s14 + $0x188] ss:$80 sps:$4 sm:$0xff]  }
  0xd5   : > { %1228 = vmatprep.subr.bf16.mxu0 %v2710_v59  ;;  %1269 = vmatprep.subr.bf16.mxu1 %v2713_v60  ;;  %v2782_v44 = vld [vmem:[%s3677_s14 + $0xe4] ss:$80 sps:$4 sm:$0xff]   ;;  %v2785_v45 = vld [vmem:[%s3677_s14 + $0xec] ss:$80 sps:$4 sm:$0xff]   ;;  %v2780_v46 = vld [vmem:[%s3677_s14 + $0xe0] ss:$80 sps:$4 sm:$0xff]  }
  0xd6   : > { %v2783_v47 = vld [vmem:[%s3677_s14 + $0xe8] ss:$80 sps:$4 sm:$0xff]   ;;  %v2788_v48 = vld [vmem:[%s3677_s14 + $0x44] ss:$80 sps:$4 sm:$0xff]   ;;  %v2791_v49 = vld [vmem:[%s3677_s14 + $0x4c] ss:$80 sps:$4 sm:$0xff]  }
  0xd7   : > { %v2786_v50 = vld [vmem:[%s3677_s14 + $0x40] ss:$80 sps:$4 sm:$0xff]   ;;  %v2789_v51 = vld [vmem:[%s3677_s14 + $0x48] ss:$80 sps:$4 sm:$0xff]   ;;  %s2378_s23 = smul.u32 (%p3168_p5), 160, %s3153_s15  ;;  %s1592_s24 = ssub.s32 (%p3168_p5), 157, %s1591_s12 }
  0xd8   : > { %1229 = vmatpush1.bf16.msra.mxu0 %v2708_v61  ;;  %1270 = vmatpush1.bf16.msra.mxu1 %v2711_v62  ;;  %p1593_p1 = scmp.lt.s32.totalorder (%p3168_p5), %s1592_s24, 20 }
  0xd9   : > { %1230 = vmatprep.subr.bf16.mxu0 %v2716_v63  ;;  %1271 = vmatprep.subr.bf16.mxu1 %v2719_v0  ;;  %s3845_s17 = scalar_lea.vmem (%p3168_p5), %s4263_s3, %s2378_s23  }
  0xdc   : > { %1231 = vmatpush1.bf16.msra.mxu0 %v2714_v1  ;;  %1272 = vmatpush1.bf16.msra.mxu1 %v2717_v2 }
  0xdd   : > { %1306 = vmatprep.subr.bf16.mxu0 %v2722_v3  ;;  %1347 = vmatprep.subr.bf16.mxu1 %v2725_v4 }
  0xdf   : > { %2336 = vmatmul.mubr.msk.bf16.vlgmr.msra.gmra.mxu0 %vm1130_vm0, %v3700_v52  ;;  %2337 = vmatmul.mubr.msk.bf16.vlgmr.msra.gmra.mxu1 %vm1130_vm0, %v3700_v52 }
  0xe0   : > { %1307 = vmatpush1.bf16.msra.mxu0 %v2720_v5  ;;  %1348 = vmatpush1.bf16.msra.mxu1 %v2723_v6 }
  0xe1   : > { %1308 = vmatprep.subr.bf16.mxu0 %v2728_v7  ;;  %1349 = vmatprep.subr.bf16.mxu1 %v2731_v8 }
  0xe2   : > { %1330 = vmatprep.mubr.bf16.mxu0 %v3114_v33  ;;  %1371 = vmatprep.mubr.bf16.mxu1 %v3114_v33 }
  0xe4   : > { %1309 = vmatpush1.bf16.msra.mxu0 %v2726_v9  ;;  %1350 = vmatpush1.bf16.msra.mxu1 %v2729_v10 }
  0xe5   : > { %1310 = vmatprep.subr.bf16.mxu0 %v2734_v11  ;;  %1351 = vmatprep.subr.bf16.mxu1 %v2737_v12 }
  0xe8   : > { %1311 = vmatpush1.bf16.msra.mxu0 %v2732_v13  ;;  %1352 = vmatpush1.bf16.msra.mxu1 %v2735_v14 }
  0xe9   : > { %1312 = vmatprep.subr.bf16.mxu0 %v2740_v15  ;;  %1353 = vmatprep.subr.bf16.mxu1 %v2743_v16 }
  0xec   : > { %1313 = vmatpush1.bf16.msra.mxu0 %v2738_v17  ;;  %1354 = vmatpush1.bf16.msra.mxu1 %v2741_v18 }
  0xed   : > { %1388 = vmatprep.subr.bf16.mxu0 %v2746_v19  ;;  %1429 = vmatprep.subr.bf16.mxu1 %v2749_v20 }
  0xef   : > { %2338 = vmatmul.mubr.msk.bf16.vlgmr.msra.gmra.mxu0 %vm1130_vm0, %v3700_v52  ;;  %2339 = vmatmul.mubr.msk.bf16.vlgmr.msra.gmra.mxu1 %vm1130_vm0, %v3700_v52 }
  0xf0   : > { %1389 = vmatpush1.bf16.msra.mxu0 %v2744_v21  ;;  %1430 = vmatpush1.bf16.msra.mxu1 %v2747_v22 }
  0xf1   : > { %1390 = vmatprep.subr.bf16.mxu0 %v2752_v23  ;;  %1431 = vmatprep.subr.bf16.mxu1 %v2755_v24 }
  0xf2   : > { %1412 = vmatprep.mubr.bf16.mxu0 %v3114_v33  ;;  %1453 = vmatprep.mubr.bf16.mxu1 %v3114_v33 }
  0xf4   : > { %1391 = vmatpush1.bf16.msra.mxu0 %v2750_v25  ;;  %1432 = vmatpush1.bf16.msra.mxu1 %v2753_v26 }
  0xf5   : > { %1392 = vmatprep.subr.bf16.mxu0 %v2758_v27  ;;  %1433 = vmatprep.subr.bf16.mxu1 %v2761_v28 }
  0xf8   : > { %1393 = vmatpush1.bf16.msra.mxu0 %v2756_v29  ;;  %1434 = vmatpush1.bf16.msra.mxu1 %v2759_v30 }
  0xf9   : > { %1394 = vmatprep.subr.bf16.mxu0 %v2764_v31  ;;  %1435 = vmatprep.subr.bf16.mxu1 %v2767_v32 }
  0xfc   : > { %1395 = vmatpush1.bf16.msra.mxu0 %v2762_v34  ;;  %1436 = vmatpush1.bf16.msra.mxu1 %v2765_v35 }
  0xfd   : > { %1470 = vmatprep.subr.bf16.mxu0 %v2770_v36  ;;  %1511 = vmatprep.subr.bf16.mxu1 %v2773_v37 }
  0xff   : > { %2340 = vmatmul.mubr.msk.bf16.vlgmr.msra.gmra.mxu0 %vm1130_vm0, %v3700_v52  ;;  %2341 = vmatmul.mubr.msk.bf16.vlgmr.msra.gmra.mxu1 %vm1130_vm0, %v3700_v52 }
 0x100   : > { %1471 = vmatpush1.bf16.msra.mxu0 %v2768_v38  ;;  %1512 = vmatpush1.bf16.msra.mxu1 %v2771_v39 }
 0x101   : > { %1472 = vmatprep.subr.bf16.mxu0 %v2776_v40  ;;  %1513 = vmatprep.subr.bf16.mxu1 %v2779_v41 }
 0x102   : > { %1494 = vmatprep.mubr.bf16.mxu0 %v3114_v33  ;;  %1535 = vmatprep.mubr.bf16.mxu1 %v3114_v33 }
 0x104   : > { %1473 = vmatpush1.bf16.msra.mxu0 %v2774_v42  ;;  %1514 = vmatpush1.bf16.msra.mxu1 %v2777_v43 }
 0x105   : > { %1474 = vmatprep.subr.bf16.mxu0 %v2782_v44  ;;  %1515 = vmatprep.subr.bf16.mxu1 %v2785_v45 }
 0x108   : > { %1475 = vmatpush1.bf16.msra.mxu0 %v2780_v46  ;;  %1516 = vmatpush1.bf16.msra.mxu1 %v2783_v47 }
 0x109   : > { %1476 = vmatprep.subr.bf16.mxu0 %v2788_v48  ;;  %1517 = vmatprep.subr.bf16.mxu1 %v2791_v49 }
 0x10c   : > { %1477 = vmatpush1.bf16.msra.mxu0 %v2786_v50  ;;  %1518 = vmatpush1.bf16.msra.mxu1 %v2789_v51 }
 0x10f   : > { %2342 = vmatmul.mubr.msk.bf16.vlgmr.msra.gmra.mxu0 %vm1130_vm0, %v3700_v52  ;;  %2343 = vmatmul.mubr.msk.bf16.vlgmr.msra.gmra.mxu1 %vm1130_vm0, %v3700_v52 }
 0x13a   : > { %v3792_v33 = vpop.permute.xlu0 %727 }
 0x18f   : > { %v1168_v53 = vpop.f32.mrf.mxu0  ;;  %v1209_v54 = vpop.f32.mrf.mxu1 }
 0x190   : > { %v1169_v55 = vadd.f32 %v1168_v53, %v3792_v33  ;;  %v1210_v56 = vadd.f32 %v1209_v54, %v3792_v33 }
 0x191   : > { %v1170_v57 = vpop.f32.mrf.mxu0  ;;  %v1211_v58 = vpop.f32.mrf.mxu1 }
 0x192   : > { %2792 = vtanh.f32 %v1169_v55  ;;  %v1171_v59 = vadd.f32 %v1170_v57, %v3792_v33  ;;  %v1212_v60 = vadd.f32 %v1211_v58, %v3792_v33 }
 0x193   : > { %2794 = vtanh.f32 %v1210_v56  ;;  %v1172_v61 = vpop.f32.mrf.mxu0  ;;  %v1213_v62 = vpop.f32.mrf.mxu1 }
 0x194   : > { %2796 = vtanh.f32 %v1171_v59 }
 0x195   : > { %2798 = vtanh.f32 %v1212_v60  ;;  %v1173_v52 = vpop.f32.mrf.mxu0  ;;  %v1214_v63 = vpop.f32.mrf.mxu1 }
 0x19f   : > { %v2793_v0 = vpop.eup %2792  ;;  %v1250_v1 = vpop.f32.mrf.mxu0 }
 0x1a0   : > { %v1291_v2 = vpop.f32.mrf.mxu1  ;;  %v2795_v3 = vpop.eup %2794  ;;  %1564 = vst [vmem:[%s3800_s29] sm:$0xff] %v2793_v0  ;;  %v1251_v4 = vadd.f32 %v1250_v1, %v3792_v33 }
 0x1a1   : > { %v1292_v5 = vadd.f32 %v1291_v2, %v3792_v33  ;;  %v2797_v6 = vpop.eup %2796  ;;  %1566 = vst [vmem:[%s3800_s29 + $0x10] sm:$0xff] %v2795_v3  ;;  %v1252_v7 = vpop.f32.mrf.mxu0 }
 0x1a2   : > { %v1293_v8 = vpop.f32.mrf.mxu1  ;;  %v2799_v9 = vpop.eup %2798  ;;  %1565 = vst [vmem:[%s3800_s29 + $0x8] sm:$0xff] %v2797_v6  ;;  %2800 = vtanh.f32 %v1251_v4  ;;  %v1253_v10 = vadd.f32 %v1252_v7, %v3792_v33 }
 0x1a3   : > { %v1294_v11 = vadd.f32 %v1293_v8, %v3792_v33  ;;  %1567 = vst [vmem:[%s3800_s29 + $0x18] sm:$0xff] %v2799_v9  ;;  %2802 = vtanh.f32 %v1292_v5  ;;  %v1254_v12 = vpop.f32.mrf.mxu0 }
 0x1a4   : > { %v1295_v13 = vpop.f32.mrf.mxu1  ;;  %2804 = vtanh.f32 %v1253_v10 }
 0x1a5   : > { %2806 = vtanh.f32 %v1294_v11  ;;  %v1255_v14 = vpop.f32.mrf.mxu0 }
 0x1a6   : > { %v1296_v15 = vpop.f32.mrf.mxu1 }
 0x1af   : > { %v2801_v16 = vpop.eup %2800  ;;  %v1332_v17 = vpop.f32.mrf.mxu0 }
 0x1b0   : > { %v1373_v18 = vpop.f32.mrf.mxu1  ;;  %v2803_v19 = vpop.eup %2802  ;;  %1568 = vst [vmem:[%s3800_s29 + $0x20] sm:$0xff] %v2801_v16  ;;  %v1333_v20 = vadd.f32 %v1332_v17, %v3792_v33 }
 0x1b1   : > { %v1374_v21 = vadd.f32 %v1373_v18, %v3792_v33  ;;  %v2805_v22 = vpop.eup %2804  ;;  %1570 = vst [vmem:[%s3800_s29 + $0x30] sm:$0xff] %v2803_v19  ;;  %v1334_v23 = vpop.f32.mrf.mxu0 }
 0x1b2   : > { %v1375_v24 = vpop.f32.mrf.mxu1  ;;  %v2807_v25 = vpop.eup %2806  ;;  %1569 = vst [vmem:[%s3800_s29 + $0x28] sm:$0xff] %v2805_v22  ;;  %2808 = vtanh.f32 %v1333_v20  ;;  %v1335_v26 = vadd.f32 %v1334_v23, %v3792_v33 }
 0x1b3   : > { %v1376_v27 = vadd.f32 %v1375_v24, %v3792_v33  ;;  %1571 = vst [vmem:[%s3800_s29 + $0x38] sm:$0xff] %v2807_v25  ;;  %2810 = vtanh.f32 %v1374_v21  ;;  %v1336_v28 = vpop.f32.mrf.mxu0 }
 0x1b4   : > { %v1377_v29 = vpop.f32.mrf.mxu1  ;;  %2812 = vtanh.f32 %v1335_v26 }
 0x1b5   : > { %2814 = vtanh.f32 %v1376_v27  ;;  %v1337_v30 = vpop.f32.mrf.mxu0 }
 0x1b6   : > { %v1378_v31 = vpop.f32.mrf.mxu1 }
 0x1bf   : > { %v2809_v32 = vpop.eup %2808  ;;  %v1414_v34 = vpop.f32.mrf.mxu0 }
 0x1c0   : > { %v1455_v35 = vpop.f32.mrf.mxu1  ;;  %v2811_v36 = vpop.eup %2810  ;;  %1572 = vst [vmem:[%s3800_s29 + $0x40] sm:$0xff] %v2809_v32  ;;  %v1415_v37 = vadd.f32 %v1414_v34, %v3792_v33 }
 0x1c1   : > { %v1456_v38 = vadd.f32 %v1455_v35, %v3792_v33  ;;  %v2813_v39 = vpop.eup %2812  ;;  %1574 = vst [vmem:[%s3800_s29 + $0x50] sm:$0xff] %v2811_v36  ;;  %v1416_v40 = vpop.f32.mrf.mxu0 }
 0x1c2   : > { %v1457_v41 = vpop.f32.mrf.mxu1  ;;  %v2815_v42 = vpop.eup %2814  ;;  %1573 = vst [vmem:[%s3800_s29 + $0x48] sm:$0xff] %v2813_v39  ;;  %2816 = vtanh.f32 %v1415_v37  ;;  %v1417_v43 = vadd.f32 %v1416_v40, %v3792_v33 }
 0x1c3   : > { %v1458_v44 = vadd.f32 %v1457_v41, %v3792_v33  ;;  %1575 = vst [vmem:[%s3800_s29 + $0x58] sm:$0xff] %v2815_v42  ;;  %2818 = vtanh.f32 %v1456_v38  ;;  %v1418_v45 = vpop.f32.mrf.mxu0 }
 0x1c4   : > { %v1459_v46 = vpop.f32.mrf.mxu1  ;;  %2820 = vtanh.f32 %v1417_v43 }
 0x1c5   : > { %2822 = vtanh.f32 %v1458_v44  ;;  %v1419_v47 = vpop.f32.mrf.mxu0 }
 0x1c6   : > { %v1460_v48 = vpop.f32.mrf.mxu1 }
 0x1cf   : > { %v2817_v49 = vpop.eup %2816  ;;  %v1496_v50 = vpop.f32.mrf.mxu0 }
 0x1d0   : > { %v1537_v51 = vpop.f32.mrf.mxu1  ;;  %v2819_v53 = vpop.eup %2818  ;;  %1576 = vst [vmem:[%s3800_s29 + $0x60] sm:$0xff] %v2817_v49  ;;  %v1497_v54 = vadd.f32 %v1496_v50, %v3792_v33 }
 0x1d1   : > { %v1538_v55 = vadd.f32 %v1537_v51, %v3792_v33  ;;  %v2821_v56 = vpop.eup %2820  ;;  %1578 = vst [vmem:[%s3800_s29 + $0x70] sm:$0xff] %v2819_v53  ;;  %v1498_v57 = vpop.f32.mrf.mxu0 }
 0x1d2   : > { %v1539_v58 = vpop.f32.mrf.mxu1  ;;  %v2823_v59 = vpop.eup %2822  ;;  %1577 = vst [vmem:[%s3800_s29 + $0x68] sm:$0xff] %v2821_v56  ;;  %2824 = vtanh.f32 %v1497_v54  ;;  %v1499_v60 = vadd.f32 %v1498_v57, %v3792_v33 }
 0x1d3   : > { %v1540_v61 = vadd.f32 %v1539_v58, %v3792_v33  ;;  %1579 = vst [vmem:[%s3800_s29 + $0x78] sm:$0xff] %v2823_v59  ;;  %2826 = vtanh.f32 %v1538_v55  ;;  %v1500_v62 = vpop.f32.mrf.mxu0 }
 0x1d4   : > { %v1541_v52 = vpop.f32.mrf.mxu1  ;;  %2828 = vtanh.f32 %v1499_v60 }
 0x1d5   : > { %2830 = vtanh.f32 %v1540_v61  ;;  %v1501_v63 = vpop.f32.mrf.mxu0 }
 0x1d6   : > { %v1542_v0 = vpop.f32.mrf.mxu1 }
 0x1df   : > { %v2825_v1 = vpop.eup %2824  ;;  %1590 = sbr.rel (!%p3168_p5) target bundleno = 630 (0x276), region = 102 }
 0x1e0   : > { %v2827_v2 = vpop.eup %2826  ;;  %1580 = vst [vmem:[%s3800_s29 + $0x80] sm:$0xff] %v2825_v1 }
 0x1e1   : > { %v2829_v3 = vpop.eup %2828  ;;  %1582 = vst [vmem:[%s3800_s29 + $0x90] sm:$0xff] %v2827_v2 }
 0x1e2   : > { %v2831_v4 = vpop.eup %2830  ;;  %1581 = vst [vmem:[%s3800_s29 + $0x88] sm:$0xff] %v2829_v3 }
 0x1e3   : > { %1583 = vst [vmem:[%s3800_s29 + $0x98] sm:$0xff] %v2831_v4 }
 0x1e4   : > { %s4305_s24 = smov (!%p1593_p1, %s1592_s24), 20 }
 0x1e5   : > { %s2344_s22 = sshll.u32 %s4305_s24, 7  ;;  %s3847_s27 = sshll.u32 %s4305_s24, 3 }
 0x1e6   : > { %p2348_p2 = scmp.eq.s32.totalorder %s2344_s22, 0 }
 0x1e7   : > { %p1603_p3 = scmp.lt.u32.totalorder (!%p2348_p2), %s3847_s27, 8 }
 0x1e8   : > { %1602 = sbr.rel (%p2348_p2) target bundleno = 630 (0x276), region = 106 }
 0x1ed   : > { %1606 = sbr.rel (%p1603_p3) target bundleno = 621 (0x26d), region = 110  ;;  %s3851_s20 = sand.u32 (!%p1603_p3), 7, %s3847_s27  }
 0x1ee   : > { %p1623_p5 = scmp.eq.s32.totalorder (!%p1603_p3), %s3851_s20, 0  ;;  %p2349_p4 = scmp.ne.s32.totalorder (!%p1603_p3), %s3851_s20, 0 }
 0x1f2   : > { %1626 = sbr.rel (%p2349_p4) target bundleno = 557 (0x22d), region = 125  ;;  %s1627_s15 = sshrl.u32 (!%p2349_p4), %s3847_s27, 3 }
 0x1f3   : > { %s3858_s8 = sshrl.u32 (!%p2349_p4), %s1627_s15, 6 }
 0x1f4   : > { %p2350_p6 = scmp.le.s32.totalorder (!%p2349_p4), %s3858_s8, 0 }
 0x1f7   : > { %2151 = sbr.rel (%p2350_p6) target bundleno = 541 (0x21d), region = 273  ;;  %s4281_s9 = smov (!%p2350_p6), %s3845_s17 }
 0x1f8   : > { %s4282_s5 = smov (!%p2350_p6), %s3800_s29  ;;  %s3867_s18 = smov (!%p2350_p6), 0  }
 0x1f9   : > { %s3869_s21 = smov (!%p2350_p6), 0  }
 0x1fc LB: >> { %v1640_v33 = vld [vmem:[%s3054_s5] sm:$0xff]  ;;  %v1642_v5 = vld [vmem:[%s3054_s5 + $0x8] sm:$0xff]  ;;  %v1644_v6 = vld [vmem:[%s3054_s5 + $0x10] sm:$0xff]  ;;  %s1768_s30 = sadd.s32 1, %s3058_s18  ;;  %s1634_s21 = sadd.s32 1, %s3062_s21   ;;  %s3062_s21 = sphi %s3869_s21, %s1634_s21   ;;  %s3058_s18 = sphi %s3867_s18, %s4285_s18   ;;  %s3054_s5 = sphi %s4282_s5, %s4284_s5   ;;  %s3050_s9 = sphi %s4281_s9, %s4283_s9  }
 0x1fd   : >> { %1641 = vst [vmem:[%s3050_s9] sm:$0xff] %v1640_v33  ;;  %1643 = vst [vmem:[%s3050_s9 + $0x8] sm:$0xff] %v1642_v5  ;;  %v1646_v7 = vld [vmem:[%s3054_s5 + $0x18] sm:$0xff]  ;;  %v1648_v8 = vld [vmem:[%s3054_s5 + $0x20] sm:$0xff]  ;;  %p1769_p7 = scmp.ge.s32.totalorder %s1768_s30, %s3858_s8  ;;  %p1633_p8 = scmp.ge.s32.totalorder %s1634_s21, %s3858_s8 }
 0x1fe   : >> { %1645 = vst [vmem:[%s3050_s9 + $0x10] sm:$0xff] %v1644_v6  ;;  %v1650_v9 = vld [vmem:[%s3054_s5 + $0x28] sm:$0xff]  ;;  %1647 = vst [vmem:[%s3050_s9 + $0x18] sm:$0xff] %v1646_v7  ;;  %v1652_v10 = vld [vmem:[%s3054_s5 + $0x30] sm:$0xff] }
 0x1ff   : >> { %1649 = vst [vmem:[%s3050_s9 + $0x20] sm:$0xff] %v1648_v8  ;;  %1651 = vst [vmem:[%s3050_s9 + $0x28] sm:$0xff] %v1650_v9  ;;  %v1654_v11 = vld [vmem:[%s3054_s5 + $0x38] sm:$0xff]  ;;  %v1656_v12 = vld [vmem:[%s3054_s5 + $0x40] sm:$0xff]  ;;  %s4307_s30 = smov (%p1769_p7, %s1768_s30), 0 }
 0x200   : >> { %1653 = vst [vmem:[%s3050_s9 + $0x30] sm:$0xff] %v1652_v10  ;;  %1655 = vst [vmem:[%s3050_s9 + $0x38] sm:$0xff] %v1654_v11  ;;  %v1658_v13 = vld [vmem:[%s3054_s5 + $0x48] sm:$0xff]  ;;  %v1660_v14 = vld [vmem:[%s3054_s5 + $0x50] sm:$0xff]  ;;  %s2351_s10 = sshll.u32 %s4307_s30, 9  ;;  %s4285_s18 = smov %s4307_s30 }
 0x201   : >> { %1657 = vst [vmem:[%s3050_s9 + $0x40] sm:$0xff] %v1656_v12  ;;  %v1662_v15 = vld [vmem:[%s3054_s5 + $0x58] sm:$0xff]  ;;  %1659 = vst [vmem:[%s3050_s9 + $0x48] sm:$0xff] %v1658_v13  ;;  %v1664_v16 = vld [vmem:[%s3054_s5 + $0x60] sm:$0xff]  ;;  %s3925_s6 = scalar_lea.vmem %s3800_s29, %s2351_s10 [#allocation3]   ;;  %s3928_s28 = scalar_lea.vmem %s3845_s17, %s2351_s10  }
 0x202   : >> { %1661 = vst [vmem:[%s3050_s9 + $0x50] sm:$0xff] %v1660_v14  ;;  %1663 = vst [vmem:[%s3050_s9 + $0x58] sm:$0xff] %v1662_v15  ;;  %v1666_v17 = vld [vmem:[%s3054_s5 + $0x68] sm:$0xff]  ;;  %v1668_v18 = vld [vmem:[%s3054_s5 + $0x70] sm:$0xff] }
 0x203   : >> { %1665 = vst [vmem:[%s3050_s9 + $0x60] sm:$0xff] %v1664_v16  ;;  %1667 = vst [vmem:[%s3050_s9 + $0x68] sm:$0xff] %v1666_v17  ;;  %v1670_v19 = vld [vmem:[%s3054_s5 + $0x78] sm:$0xff]  ;;  %v1672_v20 = vld [vmem:[%s3054_s5 + $0x80] sm:$0xff] }
 0x204   : >> { %1669 = vst [vmem:[%s3050_s9 + $0x70] sm:$0xff] %v1668_v18  ;;  %v1674_v21 = vld [vmem:[%s3054_s5 + $0x88] sm:$0xff]  ;;  %1671 = vst [vmem:[%s3050_s9 + $0x78] sm:$0xff] %v1670_v19  ;;  %v1676_v22 = vld [vmem:[%s3054_s5 + $0x90] sm:$0xff] }
 0x205   : >> { %1673 = vst [vmem:[%s3050_s9 + $0x80] sm:$0xff] %v1672_v20  ;;  %1675 = vst [vmem:[%s3050_s9 + $0x88] sm:$0xff] %v1674_v21  ;;  %v1678_v23 = vld [vmem:[%s3054_s5 + $0x98] sm:$0xff]  ;;  %v1680_v24 = vld [vmem:[%s3054_s5 + $0xa0] sm:$0xff] }
 0x206   : >> { %1677 = vst [vmem:[%s3050_s9 + $0x90] sm:$0xff] %v1676_v22  ;;  %1679 = vst [vmem:[%s3050_s9 + $0x98] sm:$0xff] %v1678_v23  ;;  %v1682_v25 = vld [vmem:[%s3054_s5 + $0xa8] sm:$0xff]  ;;  %v1684_v26 = vld [vmem:[%s3054_s5 + $0xb0] sm:$0xff] }
 0x207   : >> { %1681 = vst [vmem:[%s3050_s9 + $0xa0] sm:$0xff] %v1680_v24  ;;  %v1686_v27 = vld [vmem:[%s3054_s5 + $0xb8] sm:$0xff]  ;;  %1683 = vst [vmem:[%s3050_s9 + $0xa8] sm:$0xff] %v1682_v25  ;;  %v1688_v28 = vld [vmem:[%s3054_s5 + $0xc0] sm:$0xff] }
 0x208   : >> { %1685 = vst [vmem:[%s3050_s9 + $0xb0] sm:$0xff] %v1684_v26  ;;  %1687 = vst [vmem:[%s3050_s9 + $0xb8] sm:$0xff] %v1686_v27  ;;  %v1690_v29 = vld [vmem:[%s3054_s5 + $0xc8] sm:$0xff]  ;;  %v1692_v30 = vld [vmem:[%s3054_s5 + $0xd0] sm:$0xff] }
 0x209   : >> { %1689 = vst [vmem:[%s3050_s9 + $0xc0] sm:$0xff] %v1688_v28  ;;  %1691 = vst [vmem:[%s3050_s9 + $0xc8] sm:$0xff] %v1690_v29  ;;  %v1694_v31 = vld [vmem:[%s3054_s5 + $0xd8] sm:$0xff]  ;;  %v1696_v32 = vld [vmem:[%s3054_s5 + $0xe0] sm:$0xff] }
 0x20a   : >> { %1693 = vst [vmem:[%s3050_s9 + $0xd0] sm:$0xff] %v1692_v30  ;;  %v1698_v34 = vld [vmem:[%s3054_s5 + $0xe8] sm:$0xff]  ;;  %1695 = vst [vmem:[%s3050_s9 + $0xd8] sm:$0xff] %v1694_v31  ;;  %v1700_v35 = vld [vmem:[%s3054_s5 + $0xf0] sm:$0xff] }
 0x20b   : >> { %1697 = vst [vmem:[%s3050_s9 + $0xe0] sm:$0xff] %v1696_v32  ;;  %1699 = vst [vmem:[%s3050_s9 + $0xe8] sm:$0xff] %v1698_v34  ;;  %v1702_v36 = vld [vmem:[%s3054_s5 + $0xf8] sm:$0xff]  ;;  %v1704_v37 = vld [vmem:[%s3054_s5 + $0x100] sm:$0xff] }
 0x20c   : >> { %1701 = vst [vmem:[%s3050_s9 + $0xf0] sm:$0xff] %v1700_v35  ;;  %1703 = vst [vmem:[%s3050_s9 + $0xf8] sm:$0xff] %v1702_v36  ;;  %v1706_v38 = vld [vmem:[%s3054_s5 + $0x108] sm:$0xff]  ;;  %v1708_v39 = vld [vmem:[%s3054_s5 + $0x110] sm:$0xff] }
 0x20d   : >> { %1705 = vst [vmem:[%s3050_s9 + $0x100] sm:$0xff] %v1704_v37  ;;  %v1710_v40 = vld [vmem:[%s3054_s5 + $0x118] sm:$0xff]  ;;  %1707 = vst [vmem:[%s3050_s9 + $0x108] sm:$0xff] %v1706_v38  ;;  %v1712_v41 = vld [vmem:[%s3054_s5 + $0x120] sm:$0xff] }
 0x20e   : >> { %1709 = vst [vmem:[%s3050_s9 + $0x110] sm:$0xff] %v1708_v39  ;;  %1711 = vst [vmem:[%s3050_s9 + $0x118] sm:$0xff] %v1710_v40  ;;  %v1714_v42 = vld [vmem:[%s3054_s5 + $0x128] sm:$0xff]  ;;  %v1716_v43 = vld [vmem:[%s3054_s5 + $0x130] sm:$0xff] }
 0x20f   : >> { %1713 = vst [vmem:[%s3050_s9 + $0x120] sm:$0xff] %v1712_v41  ;;  %1715 = vst [vmem:[%s3050_s9 + $0x128] sm:$0xff] %v1714_v42  ;;  %v1718_v44 = vld [vmem:[%s3054_s5 + $0x138] sm:$0xff]  ;;  %v1720_v45 = vld [vmem:[%s3054_s5 + $0x140] sm:$0xff] }
 0x210   : >> { %1717 = vst [vmem:[%s3050_s9 + $0x130] sm:$0xff] %v1716_v43  ;;  %v1722_v46 = vld [vmem:[%s3054_s5 + $0x148] sm:$0xff]  ;;  %1719 = vst [vmem:[%s3050_s9 + $0x138] sm:$0xff] %v1718_v44  ;;  %v1724_v47 = vld [vmem:[%s3054_s5 + $0x150] sm:$0xff] }
 0x211   : >> { %1721 = vst [vmem:[%s3050_s9 + $0x140] sm:$0xff] %v1720_v45  ;;  %1723 = vst [vmem:[%s3050_s9 + $0x148] sm:$0xff] %v1722_v46  ;;  %v1726_v48 = vld [vmem:[%s3054_s5 + $0x158] sm:$0xff]  ;;  %v1728_v49 = vld [vmem:[%s3054_s5 + $0x160] sm:$0xff] }
 0x212   : >> { %1725 = vst [vmem:[%s3050_s9 + $0x150] sm:$0xff] %v1724_v47  ;;  %1727 = vst [vmem:[%s3050_s9 + $0x158] sm:$0xff] %v1726_v48  ;;  %v1730_v50 = vld [vmem:[%s3054_s5 + $0x168] sm:$0xff]  ;;  %v1732_v51 = vld [vmem:[%s3054_s5 + $0x170] sm:$0xff] }
 0x213   : >> { %1729 = vst [vmem:[%s3050_s9 + $0x160] sm:$0xff] %v1728_v49  ;;  %v1734_v53 = vld [vmem:[%s3054_s5 + $0x178] sm:$0xff]  ;;  %1731 = vst [vmem:[%s3050_s9 + $0x168] sm:$0xff] %v1730_v50  ;;  %v1736_v54 = vld [vmem:[%s3054_s5 + $0x180] sm:$0xff] }
 0x214   : >> { %1733 = vst [vmem:[%s3050_s9 + $0x170] sm:$0xff] %v1732_v51  ;;  %1735 = vst [vmem:[%s3050_s9 + $0x178] sm:$0xff] %v1734_v53  ;;  %v1738_v55 = vld [vmem:[%s3054_s5 + $0x188] sm:$0xff]  ;;  %v1740_v56 = vld [vmem:[%s3054_s5 + $0x190] sm:$0xff] }
 0x215   : >> { %1737 = vst [vmem:[%s3050_s9 + $0x180] sm:$0xff] %v1736_v54  ;;  %1739 = vst [vmem:[%s3050_s9 + $0x188] sm:$0xff] %v1738_v55  ;;  %v1742_v57 = vld [vmem:[%s3054_s5 + $0x198] sm:$0xff]  ;;  %v1744_v58 = vld [vmem:[%s3054_s5 + $0x1a0] sm:$0xff] }
 0x216   : >> { %1741 = vst [vmem:[%s3050_s9 + $0x190] sm:$0xff] %v1740_v56  ;;  %v1746_v59 = vld [vmem:[%s3054_s5 + $0x1a8] sm:$0xff]  ;;  %1743 = vst [vmem:[%s3050_s9 + $0x198] sm:$0xff] %v1742_v57  ;;  %v1748_v60 = vld [vmem:[%s3054_s5 + $0x1b0] sm:$0xff] }
 0x217   : >> { %1745 = vst [vmem:[%s3050_s9 + $0x1a0] sm:$0xff] %v1744_v58  ;;  %1747 = vst [vmem:[%s3050_s9 + $0x1a8] sm:$0xff] %v1746_v59  ;;  %v1750_v61 = vld [vmem:[%s3054_s5 + $0x1b8] sm:$0xff]  ;;  %v1752_v62 = vld [vmem:[%s3054_s5 + $0x1c0] sm:$0xff] }
 0x218   : >> { %1749 = vst [vmem:[%s3050_s9 + $0x1b0] sm:$0xff] %v1748_v60  ;;  %1751 = vst [vmem:[%s3050_s9 + $0x1b8] sm:$0xff] %v1750_v61  ;;  %v1754_v52 = vld [vmem:[%s3054_s5 + $0x1c8] sm:$0xff]  ;;  %v1756_v63 = vld [vmem:[%s3054_s5 + $0x1d0] sm:$0xff]  ;;  %1636 = sbr.rel (!%p1633_p8) target bundleno = 508 (0x1fc), region = 279 }
 0x219   : >> { %1753 = vst [vmem:[%s3050_s9 + $0x1c0] sm:$0xff] %v1752_v62  ;;  %v1758_v0 = vld [vmem:[%s3054_s5 + $0x1d8] sm:$0xff]  ;;  %1755 = vst [vmem:[%s3050_s9 + $0x1c8] sm:$0xff] %v1754_v52  ;;  %v1760_v1 = vld [vmem:[%s3054_s5 + $0x1e0] sm:$0xff] }
 0x21a   : >> { %1757 = vst [vmem:[%s3050_s9 + $0x1d0] sm:$0xff] %v1756_v63  ;;  %1759 = vst [vmem:[%s3050_s9 + $0x1d8] sm:$0xff] %v1758_v0  ;;  %v1762_v2 = vld [vmem:[%s3054_s5 + $0x1e8] sm:$0xff]  ;;  %v1764_v3 = vld [vmem:[%s3054_s5 + $0x1f0] sm:$0xff] }
 0x21b   : >> { %1761 = vst [vmem:[%s3050_s9 + $0x1e0] sm:$0xff] %v1760_v1  ;;  %1763 = vst [vmem:[%s3050_s9 + $0x1e8] sm:$0xff] %v1762_v2  ;;  %v1766_v4 = vld [vmem:[%s3054_s5 + $0x1f8] sm:$0xff]  ;;  %s4284_s5 = smov %s3925_s6 }
 0x21c   : >> { %1765 = vst [vmem:[%s3050_s9 + $0x1f0] sm:$0xff] %v1764_v3  ;;  %1767 = vst [vmem:[%s3050_s9 + $0x1f8] sm:$0xff] %v1766_v4  ;;  %s4283_s9 = smov %s3928_s28 }
 0x21d PF: > { %s4034_s14 = sand.u32 63, %s1627_s15   ;;  %s2379_s4 = sshll.u32 %s3858_s8, 13 }
 0x21e   : > { %s1779_s7 = sshra.s32 %s2379_s4, 4  ;;  %p2356_p9 = scmp.le.s32.totalorder %s4034_s14, 0 }
 0x21f   : > { %s1780_s11 = scalar_lea.vmem %s3800_s29, %s1779_s7 [#allocation3]   ;;  %s1783_s12 = scalar_lea.vmem %s3845_s17, %s1779_s7  }
 0x220   : > { %2165 = sbr.rel (%p2356_p9) target bundleno = 557 (0x22d), region = 284  ;;  %s3064_s23 = smov (!%p2356_p9), %s1783_s12  }
 0x221   : > { %s3068_s24 = smov (!%p2356_p9), %s1780_s11   ;;  %s3072_s25 = smov (!%p2356_p9), 0  }
 0x222   : > { %s3076_s26 = smov (!%p2356_p9), 0  }
 0x225 LB: >> { %v1795_v33 = vld [vmem:[%s3070_s24] sm:$0xff]  ;;  %s1797_s22 = sadd.s32 1, %s3074_s25  ;;  %s1789_s26 = sadd.s32 1, %s3078_s26   ;;  %s3078_s26 = sphi %s3076_s26, %s1789_s26   ;;  %s3074_s25 = sphi %s3072_s25, %s3073_s25   ;;  %s3070_s24 = sphi %s3068_s24, %s1802_s24   ;;  %s3066_s23 = sphi %s3064_s23, %s1803_s23  }
 0x226   : >> { %1796 = vst [vmem:[%s3066_s23] sm:$0xff] %v1795_v33  ;;  %p1798_p10 = scmp.ge.s32.totalorder %s1797_s22, %s4034_s14  ;;  %p1788_p11 = scmp.ge.s32.totalorder %s1789_s26, %s4034_s14 }
 0x228   : >> { %s4309_s22 = smov (%p1798_p10, %s1797_s22), 0  ;;  %1791 = sbr.rel (!%p1788_p11) target bundleno = 549 (0x225), region = 290 }
 0x229   : >> { %s2357_s15 = sshll.u32 %s4309_s22, 3  ;;  %s3073_s25 = smov %s4309_s22  }
 0x22a   : >> { %s1802_s24 = scalar_lea.vmem %s1780_s11, %s2357_s15 [#allocation3]   ;;  %s1803_s23 = scalar_lea.vmem %s1783_s12, %s2357_s15  }
 0x22d PF: > { %1806 = sbr.rel (%p1623_p5) target bundleno = 621 (0x26d), region = 143  ;;  %s4046_s8 = ssub.s32 (!%p1623_p5), %s3847_s27, %s3851_s20 }
 0x22e   : > { %s1812_s9 = sshrl.u32 (!%p1623_p5), %s3847_s27, 3  ;;  %s1809_s5 = scalar_lea.vmem (!%p1623_p5), %s3800_s29, %s4046_s8 [#allocation3] }
 0x22f   : > { %s1811_s18 = scalar_lea.vmem (!%p1623_p5), %s3845_s17, %s4046_s8  ;;  %s4055_s21 = sshrl.u32 (!%p1623_p5), %s1812_s9, 6 }
 0x230   : > { %p2359_p12 = scmp.le.s32.totalorder (!%p1623_p5), %s4055_s21, 0 }
 0x232   : > { %2179 = sbr.rel (%p2359_p12) target bundleno = 600 (0x258), region = 295  ;;  %s4286_s30 = smov (!%p2359_p12), %s3845_s17 }
 0x233   : > { %s4287_s10 = smov (!%p2359_p12), %s3800_s29  ;;  %s4064_s6 = smov (!%p2359_p12), 0  }
 0x234   : > { %s4066_s28 = smov (!%p2359_p12), 0  }
 0x237 LB: >> { %v1825_v5 = vld [vmem:[%s3086_s10] sm:$0xff]  ;;  %v1827_v6 = vld [vmem:[%s3086_s10 + $0x8] sm:$0xff]  ;;  %v1829_v7 = vld [vmem:[%s3086_s10 + $0x10] sm:$0xff]  ;;  %s1953_s14 = sadd.s32 1, %s3090_s6  ;;  %s1819_s28 = sadd.s32 1, %s3094_s28   ;;  %s3094_s28 = sphi %s4066_s28, %s1819_s28   ;;  %s3090_s6 = sphi %s4064_s6, %s4290_s6   ;;  %s3086_s10 = sphi %s4287_s10, %s4289_s10   ;;  %s3082_s30 = sphi %s4286_s30, %s4288_s30  }
 0x238   : >> { %1826 = vst [vmem:[%s3082_s30] sm:$0xff] %v1825_v5  ;;  %1828 = vst [vmem:[%s3082_s30 + $0x8] sm:$0xff] %v1827_v6  ;;  %v1831_v8 = vld [vmem:[%s3086_s10 + $0x18] sm:$0xff]  ;;  %v1833_v9 = vld [vmem:[%s3086_s10 + $0x20] sm:$0xff]  ;;  %p1954_p13 = scmp.ge.s32.totalorder %s1953_s14, %s4055_s21  ;;  %p1818_p0 = scmp.ge.s32.totalorder %s1819_s28, %s4055_s21 }
 0x239   : >> { %1830 = vst [vmem:[%s3082_s30 + $0x10] sm:$0xff] %v1829_v7  ;;  %v1835_v10 = vld [vmem:[%s3086_s10 + $0x28] sm:$0xff]  ;;  %1832 = vst [vmem:[%s3082_s30 + $0x18] sm:$0xff] %v1831_v8  ;;  %v1837_v11 = vld [vmem:[%s3086_s10 + $0x30] sm:$0xff] }
 0x23a   : >> { %1834 = vst [vmem:[%s3082_s30 + $0x20] sm:$0xff] %v1833_v9  ;;  %1836 = vst [vmem:[%s3082_s30 + $0x28] sm:$0xff] %v1835_v10  ;;  %v1839_v12 = vld [vmem:[%s3086_s10 + $0x38] sm:$0xff]  ;;  %v1841_v13 = vld [vmem:[%s3086_s10 + $0x40] sm:$0xff]  ;;  %s4311_s14 = smov (%p1954_p13, %s1953_s14), 0 }
 0x23b   : >> { %1838 = vst [vmem:[%s3082_s30 + $0x30] sm:$0xff] %v1837_v11  ;;  %1840 = vst [vmem:[%s3082_s30 + $0x38] sm:$0xff] %v1839_v12  ;;  %v1843_v14 = vld [vmem:[%s3086_s10 + $0x48] sm:$0xff]  ;;  %v1845_v15 = vld [vmem:[%s3086_s10 + $0x50] sm:$0xff]  ;;  %s2360_s4 = sshll.u32 %s4311_s14, 9  ;;  %s4290_s6 = smov %s4311_s14 }
 0x23c   : >> { %1842 = vst [vmem:[%s3082_s30 + $0x40] sm:$0xff] %v1841_v13  ;;  %v1847_v16 = vld [vmem:[%s3086_s10 + $0x58] sm:$0xff]  ;;  %1844 = vst [vmem:[%s3082_s30 + $0x48] sm:$0xff] %v1843_v14  ;;  %v1849_v17 = vld [vmem:[%s3086_s10 + $0x60] sm:$0xff]  ;;  %s4122_s7 = scalar_lea.vmem %s3800_s29, %s2360_s4 [#allocation3]   ;;  %s4125_s11 = scalar_lea.vmem %s3845_s17, %s2360_s4  }
 0x23d   : >> { %1846 = vst [vmem:[%s3082_s30 + $0x50] sm:$0xff] %v1845_v15  ;;  %1848 = vst [vmem:[%s3082_s30 + $0x58] sm:$0xff] %v1847_v16  ;;  %v1851_v18 = vld [vmem:[%s3086_s10 + $0x68] sm:$0xff]  ;;  %v1853_v19 = vld [vmem:[%s3086_s10 + $0x70] sm:$0xff] }
 0x23e   : >> { %1850 = vst [vmem:[%s3082_s30 + $0x60] sm:$0xff] %v1849_v17  ;;  %1852 = vst [vmem:[%s3082_s30 + $0x68] sm:$0xff] %v1851_v18  ;;  %v1855_v20 = vld [vmem:[%s3086_s10 + $0x78] sm:$0xff]  ;;  %v1857_v21 = vld [vmem:[%s3086_s10 + $0x80] sm:$0xff] }
 0x23f   : >> { %1854 = vst [vmem:[%s3082_s30 + $0x70] sm:$0xff] %v1853_v19  ;;  %v1859_v22 = vld [vmem:[%s3086_s10 + $0x88] sm:$0xff]  ;;  %1856 = vst [vmem:[%s3082_s30 + $0x78] sm:$0xff] %v1855_v20  ;;  %v1861_v23 = vld [vmem:[%s3086_s10 + $0x90] sm:$0xff] }
 0x240   : >> { %1858 = vst [vmem:[%s3082_s30 + $0x80] sm:$0xff] %v1857_v21  ;;  %1860 = vst [vmem:[%s3082_s30 + $0x88] sm:$0xff] %v1859_v22  ;;  %v1863_v24 = vld [vmem:[%s3086_s10 + $0x98] sm:$0xff]  ;;  %v1865_v25 = vld [vmem:[%s3086_s10 + $0xa0] sm:$0xff] }
 0x241   : >> { %1862 = vst [vmem:[%s3082_s30 + $0x90] sm:$0xff] %v1861_v23  ;;  %1864 = vst [vmem:[%s3082_s30 + $0x98] sm:$0xff] %v1863_v24  ;;  %v1867_v26 = vld [vmem:[%s3086_s10 + $0xa8] sm:$0xff]  ;;  %v1869_v27 = vld [vmem:[%s3086_s10 + $0xb0] sm:$0xff] }
 0x242   : >> { %1866 = vst [vmem:[%s3082_s30 + $0xa0] sm:$0xff] %v1865_v25  ;;  %v1871_v28 = vld [vmem:[%s3086_s10 + $0xb8] sm:$0xff]  ;;  %1868 = vst [vmem:[%s3082_s30 + $0xa8] sm:$0xff] %v1867_v26  ;;  %v1873_v29 = vld [vmem:[%s3086_s10 + $0xc0] sm:$0xff] }
 0x243   : >> { %1870 = vst [vmem:[%s3082_s30 + $0xb0] sm:$0xff] %v1869_v27  ;;  %1872 = vst [vmem:[%s3082_s30 + $0xb8] sm:$0xff] %v1871_v28  ;;  %v1875_v30 = vld [vmem:[%s3086_s10 + $0xc8] sm:$0xff]  ;;  %v1877_v31 = vld [vmem:[%s3086_s10 + $0xd0] sm:$0xff] }
 0x244   : >> { %1874 = vst [vmem:[%s3082_s30 + $0xc0] sm:$0xff] %v1873_v29  ;;  %1876 = vst [vmem:[%s3082_s30 + $0xc8] sm:$0xff] %v1875_v30  ;;  %v1879_v32 = vld [vmem:[%s3086_s10 + $0xd8] sm:$0xff]  ;;  %v1881_v34 = vld [vmem:[%s3086_s10 + $0xe0] sm:$0xff] }
 0x245   : >> { %1878 = vst [vmem:[%s3082_s30 + $0xd0] sm:$0xff] %v1877_v31  ;;  %v1883_v35 = vld [vmem:[%s3086_s10 + $0xe8] sm:$0xff]  ;;  %1880 = vst [vmem:[%s3082_s30 + $0xd8] sm:$0xff] %v1879_v32  ;;  %v1885_v36 = vld [vmem:[%s3086_s10 + $0xf0] sm:$0xff] }
 0x246   : >> { %1882 = vst [vmem:[%s3082_s30 + $0xe0] sm:$0xff] %v1881_v34  ;;  %1884 = vst [vmem:[%s3082_s30 + $0xe8] sm:$0xff] %v1883_v35  ;;  %v1887_v37 = vld [vmem:[%s3086_s10 + $0xf8] sm:$0xff]  ;;  %v1889_v38 = vld [vmem:[%s3086_s10 + $0x100] sm:$0xff] }
 0x247   : >> { %1886 = vst [vmem:[%s3082_s30 + $0xf0] sm:$0xff] %v1885_v36  ;;  %1888 = vst [vmem:[%s3082_s30 + $0xf8] sm:$0xff] %v1887_v37  ;;  %v1891_v39 = vld [vmem:[%s3086_s10 + $0x108] sm:$0xff]  ;;  %v1893_v40 = vld [vmem:[%s3086_s10 + $0x110] sm:$0xff] }
 0x248   : >> { %1890 = vst [vmem:[%s3082_s30 + $0x100] sm:$0xff] %v1889_v38  ;;  %v1895_v41 = vld [vmem:[%s3086_s10 + $0x118] sm:$0xff]  ;;  %1892 = vst [vmem:[%s3082_s30 + $0x108] sm:$0xff] %v1891_v39  ;;  %v1897_v42 = vld [vmem:[%s3086_s10 + $0x120] sm:$0xff] }
 0x249   : >> { %1894 = vst [vmem:[%s3082_s30 + $0x110] sm:$0xff] %v1893_v40  ;;  %1896 = vst [vmem:[%s3082_s30 + $0x118] sm:$0xff] %v1895_v41  ;;  %v1899_v43 = vld [vmem:[%s3086_s10 + $0x128] sm:$0xff]  ;;  %v1901_v44 = vld [vmem:[%s3086_s10 + $0x130] sm:$0xff] }
 0x24a   : >> { %1898 = vst [vmem:[%s3082_s30 + $0x120] sm:$0xff] %v1897_v42  ;;  %1900 = vst [vmem:[%s3082_s30 + $0x128] sm:$0xff] %v1899_v43  ;;  %v1903_v45 = vld [vmem:[%s3086_s10 + $0x138] sm:$0xff]  ;;  %v1905_v46 = vld [vmem:[%s3086_s10 + $0x140] sm:$0xff] }
 0x24b   : >> { %1902 = vst [vmem:[%s3082_s30 + $0x130] sm:$0xff] %v1901_v44  ;;  %v1907_v47 = vld [vmem:[%s3086_s10 + $0x148] sm:$0xff]  ;;  %1904 = vst [vmem:[%s3082_s30 + $0x138] sm:$0xff] %v1903_v45  ;;  %v1909_v48 = vld [vmem:[%s3086_s10 + $0x150] sm:$0xff] }
 0x24c   : >> { %1906 = vst [vmem:[%s3082_s30 + $0x140] sm:$0xff] %v1905_v46  ;;  %1908 = vst [vmem:[%s3082_s30 + $0x148] sm:$0xff] %v1907_v47  ;;  %v1911_v49 = vld [vmem:[%s3086_s10 + $0x158] sm:$0xff]  ;;  %v1913_v50 = vld [vmem:[%s3086_s10 + $0x160] sm:$0xff] }
 0x24d   : >> { %1910 = vst [vmem:[%s3082_s30 + $0x150] sm:$0xff] %v1909_v48  ;;  %1912 = vst [vmem:[%s3082_s30 + $0x158] sm:$0xff] %v1911_v49  ;;  %v1915_v51 = vld [vmem:[%s3086_s10 + $0x168] sm:$0xff]  ;;  %v1917_v53 = vld [vmem:[%s3086_s10 + $0x170] sm:$0xff] }
 0x24e   : >> { %1914 = vst [vmem:[%s3082_s30 + $0x160] sm:$0xff] %v1913_v50  ;;  %v1919_v54 = vld [vmem:[%s3086_s10 + $0x178] sm:$0xff]  ;;  %1916 = vst [vmem:[%s3082_s30 + $0x168] sm:$0xff] %v1915_v51  ;;  %v1921_v55 = vld [vmem:[%s3086_s10 + $0x180] sm:$0xff] }
 0x24f   : >> { %1918 = vst [vmem:[%s3082_s30 + $0x170] sm:$0xff] %v1917_v53  ;;  %1920 = vst [vmem:[%s3082_s30 + $0x178] sm:$0xff] %v1919_v54  ;;  %v1923_v56 = vld [vmem:[%s3086_s10 + $0x188] sm:$0xff]  ;;  %v1925_v57 = vld [vmem:[%s3086_s10 + $0x190] sm:$0xff] }
 0x250   : >> { %1922 = vst [vmem:[%s3082_s30 + $0x180] sm:$0xff] %v1921_v55  ;;  %1924 = vst [vmem:[%s3082_s30 + $0x188] sm:$0xff] %v1923_v56  ;;  %v1927_v58 = vld [vmem:[%s3086_s10 + $0x198] sm:$0xff]  ;;  %v1929_v59 = vld [vmem:[%s3086_s10 + $0x1a0] sm:$0xff] }
 0x251   : >> { %1926 = vst [vmem:[%s3082_s30 + $0x190] sm:$0xff] %v1925_v57  ;;  %v1931_v60 = vld [vmem:[%s3086_s10 + $0x1a8] sm:$0xff]  ;;  %1928 = vst [vmem:[%s3082_s30 + $0x198] sm:$0xff] %v1927_v58  ;;  %v1933_v61 = vld [vmem:[%s3086_s10 + $0x1b0] sm:$0xff] }
 0x252   : >> { %1930 = vst [vmem:[%s3082_s30 + $0x1a0] sm:$0xff] %v1929_v59  ;;  %1932 = vst [vmem:[%s3082_s30 + $0x1a8] sm:$0xff] %v1931_v60  ;;  %v1935_v62 = vld [vmem:[%s3086_s10 + $0x1b8] sm:$0xff]  ;;  %v1937_v52 = vld [vmem:[%s3086_s10 + $0x1c0] sm:$0xff] }
 0x253   : >> { %1934 = vst [vmem:[%s3082_s30 + $0x1b0] sm:$0xff] %v1933_v61  ;;  %1936 = vst [vmem:[%s3082_s30 + $0x1b8] sm:$0xff] %v1935_v62  ;;  %v1939_v63 = vld [vmem:[%s3086_s10 + $0x1c8] sm:$0xff]  ;;  %v1941_v0 = vld [vmem:[%s3086_s10 + $0x1d0] sm:$0xff]  ;;  %1821 = sbr.rel (!%p1818_p0) target bundleno = 567 (0x237), region = 301 }
 0x254   : >> { %1938 = vst [vmem:[%s3082_s30 + $0x1c0] sm:$0xff] %v1937_v52  ;;  %v1943_v1 = vld [vmem:[%s3086_s10 + $0x1d8] sm:$0xff]  ;;  %1940 = vst [vmem:[%s3082_s30 + $0x1c8] sm:$0xff] %v1939_v63  ;;  %v1945_v2 = vld [vmem:[%s3086_s10 + $0x1e0] sm:$0xff] }
 0x255   : >> { %1942 = vst [vmem:[%s3082_s30 + $0x1d0] sm:$0xff] %v1941_v0  ;;  %1944 = vst [vmem:[%s3082_s30 + $0x1d8] sm:$0xff] %v1943_v1  ;;  %v1947_v3 = vld [vmem:[%s3086_s10 + $0x1e8] sm:$0xff]  ;;  %v1949_v4 = vld [vmem:[%s3086_s10 + $0x1f0] sm:$0xff] }
 0x256   : >> { %1946 = vst [vmem:[%s3082_s30 + $0x1e0] sm:$0xff] %v1945_v2  ;;  %1948 = vst [vmem:[%s3082_s30 + $0x1e8] sm:$0xff] %v1947_v3  ;;  %v1951_v33 = vld [vmem:[%s3086_s10 + $0x1f8] sm:$0xff]  ;;  %s4289_s10 = smov %s4122_s7 }
 0x257   : >> { %1950 = vst [vmem:[%s3082_s30 + $0x1f0] sm:$0xff] %v1949_v4  ;;  %1952 = vst [vmem:[%s3082_s30 + $0x1f8] sm:$0xff] %v1951_v33  ;;  %s4288_s30 = smov %s4125_s11 }
 0x258 PF: > { %s4231_s12 = sand.u32 63, %s1812_s9   ;;  %s2381_s23 = sshll.u32 %s4055_s21, 13 }
 0x259   : > { %s1964_s24 = sshra.s32 %s2381_s23, 4  ;;  %p2365_p1 = scmp.le.s32.totalorder %s4231_s12, 0 }
 0x25a   : > { %s1965_s25 = scalar_lea.vmem %s3800_s29, %s1964_s24 [#allocation3]   ;;  %s1968_s26 = scalar_lea.vmem %s3845_s17, %s1964_s24  }
 0x25b   : > { %2193 = sbr.rel (%p2365_p1) target bundleno = 616 (0x268), region = 306  ;;  %s3096_s22 = smov (!%p2365_p1), %s1968_s26  }
 0x25c   : > { %s3100_s15 = smov (!%p2365_p1), %s1965_s25   ;;  %s3104_s14 = smov (!%p2365_p1), 0  }
 0x25d   : > { %s3108_s28 = smov (!%p2365_p1), 0  }
 0x260 LB: >> { %v1980_v5 = vld [vmem:[%s3102_s15] sm:$0xff]  ;;  %s1982_s9 = sadd.s32 1, %s3106_s14  ;;  %s1974_s28 = sadd.s32 1, %s3110_s28   ;;  %s3110_s28 = sphi %s3108_s28, %s1974_s28   ;;  %s3106_s14 = sphi %s3104_s14, %s3105_s14   ;;  %s3102_s15 = sphi %s3100_s15, %s1987_s15   ;;  %s3098_s22 = sphi %s3096_s22, %s1988_s22  }
 0x261   : >> { %1981 = vst [vmem:[%s3098_s22] sm:$0xff] %v1980_v5  ;;  %p1983_p2 = scmp.ge.s32.totalorder %s1982_s9, %s4231_s12  ;;  %p1973_p3 = scmp.ge.s32.totalorder %s1974_s28, %s4231_s12 }
 0x263   : >> { %s4313_s9 = smov (%p1983_p2, %s1982_s9), 0  ;;  %1976 = sbr.rel (!%p1973_p3) target bundleno = 608 (0x260), region = 312 }
 0x264   : >> { %s2366_s21 = sshll.u32 %s4313_s9, 3  ;;  %s3105_s14 = smov %s4313_s9  }
 0x265   : >> { %s1987_s15 = scalar_lea.vmem %s1965_s25, %s2366_s21 [#allocation3]   ;;  %s1988_s22 = scalar_lea.vmem %s1968_s26, %s2366_s21  }
 0x268 PF: > { %s3115_s30 = smov 1  }
 0x269   : > { %s1989_s10 = sshll.u32 %s3115_s30, %s3851_s20 }
 0x26a   : > { %s2368_s6 = sadd.s32 4294967295, %s1989_s10 }
 0x26b   : > { %v1999_v6 = vld [vmem:[%s1809_s5] sm:%s2368_s6] }
 0x26c   : > { %2000 = vst [vmem:[%s1811_s18] sm:%s2368_s6] %v1999_v6 }
 0x26d PF: > { %p2369_p5 = scmp.ge.u32.totalorder %s3847_s27, 8 }
 0x26e   : > { %s3116_s4 = smov (!%p2369_p5), 1  }
 0x26f   : > { %1609 = sbr.rel (%p2369_p5) target bundleno = 630 (0x276), region = 114  ;;  %s1610_s7 = sshll.u32 (!%p2369_p5), %s3116_s4, %s3847_s27 }
 0x270   : > { %s2370_s11 = sadd.s32 (!%p2369_p5), 4294967295, %s1610_s7 }
 0x274   : > { %v1620_v7 = vld [vmem:[%s3800_s29] sm:%s2370_s11] }
 0x275   : > { %1621 = vst [vmem:[%s3845_s17] sm:%s2370_s11] %v1620_v7 }
 0x276 PF: > { %p10_p4 = scmp.ge.s32.totalorder %s3156_s16, 10   ;;  %s4291_s12 = smov %s2978_s13 }
 0x277   : > { %s4292_s13 = smov %s3166_s19  ;;  %s4293_s14 = smov %s3156_s16 }
 0x278   :  { %12 = sbr.rel (!%p10_p4) target bundleno = 2 (0x2), region = 323 }

</bundles_post_ra>
